<compile_context>
chip_gen: v5e
topology: v5e:2x2
jax: 0.10.0
libtpu: 0.0.40
codegen_flags: <defaults>
</compile_context>

<pallas_src>
import jax
import jax.numpy as jnp
from jax import lax
from jax.experimental import pallas as pl
from jax.experimental.pallas import tpu as pltpu


# ----------------------------- Pallas kernels -----------------------------

def _encoder_fused_kernel(fc_ref, x_ref, adj_ref, eps_ref,
                          wenc_ref, wsrc_ref, wdst_ref, benc_ref,
                          hg_ref, bg_ref, wn_ref, bn_ref,
                          ex_ref, el_ref, sdec_ref, ebp_ref, sbp_ref, z_ref):
    # fc_ref: SMEM (4,)  [we, be, ws, bs]        x_ref: (1, N, D)   adj_ref: (1, N, N)
    # eps_ref: (1, H, N, N)                      wenc_ref: (D, H*O)
    # wsrc/wdst: (1, H*O)   benc: (1, H*O)       hg: (D, D)   bg: (1, D)
    # wn: (D, 2D) = [noisex | noisel]            bn: (1, 2D)
    N = x_ref.shape[1]
    D = x_ref.shape[2]
    HO = wenc_ref.shape[1]
    H = eps_ref.shape[1]
    O = HO // H

    x = x_ref[0]                                                     # (N, D)
    adj = adj_ref[0]                                                 # (N, N)
    wsrc = wsrc_ref[...]                                             # (1, HO)
    wdst = wdst_ref[...]                                             # (1, HO)

    we = fc_ref[0]; be = fc_ref[1]                                   # fce : Linear(1,1)
    ws = fc_ref[2]; bs = fc_ref[3]                                   # fcs : Linear(1,1)

    # one wide matmul for all heads: (N, D) @ (D, H*O)
    h_all = jnp.dot(x, wenc_ref[...], preferred_element_type=jnp.float32)
    th = jnp.tanh(h_all)

    col_ids = lax.broadcasted_iota(jnp.int32, (1, HO), 1)
    feat = jnp.zeros((N, HO), jnp.float32)

    for h in range(H):                                               # static unroll, H tiny
        hm = jnp.logical_and(col_ids >= h * O, col_ids < (h + 1) * O)   # (1, HO)
        hm_f = hm.astype(jnp.float32)
        # per-node src score (VPU reduce) and dst score as a single (1,HO)x(HO,N) row product
        a_src = jnp.sum(th * (wsrc * hm_f), axis=-1, keepdims=True)     # (N, 1)
        a_dst = lax.dot_general(wdst * hm_f, th, (((1,), (1,)), ((), ())),
                                preferred_element_type=jnp.float32)     # (1, N)
        scores = a_src + a_dst                                          # (N, N)
        scores = jnp.where(scores > 0, scores, 0.2 * scores)            # LeakyReLU(0.2)
        scores = jnp.where(adj > 0, scores, -1e9)                       # mask non-edges
        m = jnp.max(scores, axis=-1, keepdims=True)
        probs = jnp.exp(scores - m)
        attn = probs * pl.reciprocal(jnp.sum(probs, axis=-1, keepdims=True),
                                     approx=True)                       # row softmax
        # head-h features land directly in their lane slice of the (N, H*O) feature slab
        feat = feat + jnp.dot(attn, jnp.where(hm, h_all, 0.0),
                              preferred_element_type=jnp.float32)

        # ----- edge VAE on this head's attention matrix (adjB_list[:, h]) -----
        e = we * attn + be
        logvar = ws * attn + bs
        ebp_ref[0, h] = e                    # e_bp (detach is a numerical no-op)
        sbp_ref[0, h] = logvar               # s_bp
        zz = eps_ref[0, h] * jnp.exp(0.5 * logvar) + e                   # reparameterization
        z_ref[0, h] = jnp.where(attn == 0.0, attn, zz)

    # ELU + gated residual combine -> fU
    feat = feat + benc_ref[...]
    feat = jnp.where(feat > 0, feat, jnp.exp(jnp.minimum(feat, 0.0)) - 1.0)
    gate = jax.nn.sigmoid(jnp.dot(x, hg_ref[...], preferred_element_type=jnp.float32)
                          + bg_ref[...])
    fU = gate * feat + (1.0 - gate) * x                                  # (N, D)  (HO == D)

    # fused noise heads: [Ex | El] = fU @ [Wx | Wl] + [bx | bl]
    exel = jnp.dot(fU, wn_ref[...], preferred_element_type=jnp.float32) + bn_ref[...]
    Ex = exel[:, :D]
    El = exel[:, D:]
    ex_ref[0] = Ex
    el_ref[0] = El

    # Attentiondecoder (Sdecoder): S = (sigmoid(x)*sigmoid(El) / colsum) * x
    pxpl = jax.nn.sigmoid(x) * jax.nn.sigmoid(El)
    denom = jnp.sum(pxpl, axis=0, keepdims=True)          # sum over dim=-2 (nodes)
    sdec_ref[0] = (pxpl * pl.reciprocal(denom, approx=True)) * x


def _decoder_fused_kernel(ex_ref, binv_ref, wdec_ref, bdec_ref, hg_ref, bg_ref, u_ref):
    # ex_ref: (1, N, D)   binv_ref: (1, H, N, N)   wdec: (D, H*O)   bdec: (1, H*O)
    N = ex_ref.shape[1]
    HO = wdec_ref.shape[1]
    H = binv_ref.shape[1]
    O = HO // H

    x = ex_ref[0]                                                    # (N, D)
    h_all = jnp.dot(x, wdec_ref[...], preferred_element_type=jnp.float32)   # (N, HO)
    col_ids = lax.broadcasted_iota(jnp.int32, (1, HO), 1)
    feat = jnp.zeros((N, HO), jnp.float32)
    for h in range(H):                                               # static unroll
        hm = jnp.logical_and(col_ids >= h * O, col_ids < (h + 1) * O)
        feat = feat + jnp.dot(binv_ref[0, h], jnp.where(hm, h_all, 0.0),
                              preferred_element_type=jnp.float32)
    feat = feat + bdec_ref[...]
    feat = jnp.where(feat > 0, feat, jnp.exp(jnp.minimum(feat, 0.0)) - 1.0)   # ELU
    gate = jax.nn.sigmoid(jnp.dot(x, hg_ref[...], preferred_element_type=jnp.float32)
                          + bg_ref[...])
    u_ref[0] = gate * feat + (1.0 - gate) * x


# ----------------------------- wrappers -----------------------------

def encoder_fused(p, x, adj, eps):
    B, N, D = x.shape
    H = eps.shape[1]
    HO = p["enc_W"].shape[1]
    f32 = jnp.float32
    return pl.pallas_call(
        _encoder_fused_kernel,
        out_shape=(jax.ShapeDtypeStruct((B, N, D), f32),        # Ex
                   jax.ShapeDtypeStruct((B, N, D), f32),        # El
                   jax.ShapeDtypeStruct((B, N, D), f32),        # S
                   jax.ShapeDtypeStruct((B, H, N, N), f32),     # e_bp
                   jax.ShapeDtypeStruct((B, H, N, N), f32),     # s_bp
                   jax.ShapeDtypeStruct((B, H, N, N), f32)),    # z
        grid=(B,),
        in_specs=[pl.BlockSpec(memory_space=pltpu.MemorySpace.SMEM),      # fce/fcs scalars
                  pl.BlockSpec((1, N, D), lambda b: (b, 0, 0)),           # x
                  pl.BlockSpec((1, N, N), lambda b: (b, 0, 0)),           # adj
                  pl.BlockSpec((1, H, N, N), lambda b: (b, 0, 0, 0)),     # eps
                  pl.BlockSpec((D, HO), lambda b: (0, 0)),                # enc_W (all heads)
                  pl.BlockSpec((1, HO), lambda b: (0, 0)),                # enc_wsrc
                  pl.BlockSpec((1, HO), lambda b: (0, 0)),                # enc_wdst
                  pl.BlockSpec((1, HO), lambda b: (0, 0)),                # enc_b
                  pl.BlockSpec((D, D), lambda b: (0, 0)),                 # enc_Hg
                  pl.BlockSpec((1, D), lambda b: (0, 0)),                 # enc_bg
                  pl.BlockSpec((D, 2 * D), lambda b: (0, 0)),             # noise_W
                  pl.BlockSpec((1, 2 * D), lambda b: (0, 0))],            # noise_b
        out_specs=(pl.BlockSpec((1, N, D), lambda b: (b, 0, 0)),
                   pl.BlockSpec((1, N, D), lambda b: (b, 0, 0)),
                   pl.BlockSpec((1, N, D), lambda b: (b, 0, 0)),
                   pl.BlockSpec((1, H, N, N), lambda b: (b, 0, 0, 0)),
                   pl.BlockSpec((1, H, N, N), lambda b: (b, 0, 0, 0)),
                   pl.BlockSpec((1, H, N, N), lambda b: (b, 0, 0, 0))),
        compiler_params=pltpu.CompilerParams(dimension_semantics=("parallel",)),
    )(p["fc"], x, adj, eps, p["enc_W"], p["enc_wsrc"], p["enc_wdst"], p["enc_b"],
      p["enc_Hg"], p["enc_bg"], p["noise_W"], p["noise_b"])


def decoder_fused(p, ex, b_inv):
    B, N, D = ex.shape
    H = b_inv.shape[1]
    HO = p["dec_W"].shape[1]
    return pl.pallas_call(
        _decoder_fused_kernel,
        out_shape=jax.ShapeDtypeStruct((B, N, D), jnp.float32),
        grid=(B,),
        in_specs=[pl.BlockSpec((1, N, D), lambda b: (b, 0, 0)),           # Ex
                  pl.BlockSpec((1, H, N, N), lambda b: (b, 0, 0, 0)),     # b_inv
                  pl.BlockSpec((D, HO), lambda b: (0, 0)),                # dec_W
                  pl.BlockSpec((1, HO), lambda b: (0, 0)),                # dec_b
                  pl.BlockSpec((D, D), lambda b: (0, 0)),                 # dec_Hg
                  pl.BlockSpec((1, D), lambda b: (0, 0))],                # dec_bg
        out_specs=pl.BlockSpec((1, N, D), lambda b: (b, 0, 0)),
        compiler_params=pltpu.CompilerParams(dimension_semantics=("parallel",)),
    )(ex, b_inv, p["dec_W"], p["dec_b"], p["dec_Hg"], p["dec_bg"])


# ----------------------------- model glue -----------------------------

def init_params(key, emb_dim, feat_dim, heads):
    D, O, H = emb_dim, feat_dim, heads
    HO = H * O
    assert HO == D, "gated residual combine requires multihead * gat_feat_dim == emb_dim"
    ks = jax.random.split(key, 12)
    nrm = lambda k, s, sc: jax.random.normal(k, s, jnp.float32) * sc
    return {
        # per-head weights concatenated along lanes -> one wide matmul in-kernel
        "enc_W":    nrm(ks[0], (D, HO), 1.0 / jnp.sqrt(D)),
        "enc_b":    nrm(ks[1], (1, HO), 0.1),
        "enc_wsrc": nrm(ks[2], (1, HO), 1.0 / jnp.sqrt(O)),
        "enc_wdst": nrm(ks[3], (1, HO), 1.0 / jnp.sqrt(O)),
        "enc_Hg":   nrm(ks[4], (D, D), 1.0 / jnp.sqrt(D)),
        "enc_bg":   nrm(ks[5], (1, D), 0.1),
        "dec_W":    nrm(ks[6], (D, HO), 1.0 / jnp.sqrt(D)),
        "dec_b":    nrm(ks[7], (1, HO), 0.1),
        "dec_Hg":   nrm(ks[8], (D, D), 1.0 / jnp.sqrt(D)),
        "dec_bg":   nrm(ks[9], (1, D), 0.1),
        # noisex / noisel fused: (D, 2D) weight, (1, 2D) bias
        "noise_W":  nrm(ks[10], (D, 2 * D), 1.0 / jnp.sqrt(D)),
        "noise_b":  nrm(ks[11], (1, 2 * D), 0.1),
        # fce / fcs are nn.Linear(1,1): scalar weight & bias each -> [we, be, ws, bs]
        "fc":       jnp.array([0.3, 0.1, -0.5, -1.0], jnp.float32),
    }


def gat_vae_forward(p, doc_sents_h, doc_len, adj, eps_key, heads):
    B, N, D = doc_sents_h.shape

    # ---- fused encoder + noise heads + Sdecoder + edge VAE (one pallas_call) ----
    eps = jax.random.normal(eps_key, (B, heads, N, N), jnp.float32)   # torch.randn_like
    Ex, El, S, e_bp, s_bp, z = encoder_fused(p, doc_sents_h, adj, eps)

    # ---- rank penalty ----
    # TODO(synk): torch.linalg.matrix_rank (SVD) has no Pallas equivalent; stays at JAX level.
    posL = jnp.maximum(El, 0.0)
    biL = jnp.where(posL == 0.0, posL, jnp.ones_like(posL))
    row_mask = (jnp.arange(N)[None, :] < doc_len[:, None]).astype(biL.dtype)
    ranks = jnp.linalg.matrix_rank(biL * row_mask[:, :, None])   # zero rows don't change rank
    rankp = (ranks // doc_len).astype(doc_len.dtype)             # matches torch int truncation

    # ---- GATVAEdecoder ----
    # TODO(synk): GATdecoderlayer source not provided; DAG-GNN style decode used:
    #             b_inv = (I - z)^{-1} (JAX-level inverse), feat = b_inv @ (Ex @ W_dec) per head.
    b_inv = jnp.linalg.inv(jnp.eye(N, dtype=jnp.float32)[None, None] - z)
    U = decoder_fused(p, Ex, b_inv)

    return U, b_inv, e_bp, s_bp, rankp, S


if __name__ == "__main__":
    key = jax.random.PRNGKey(0)
    k_param, k_x, k_adj, k_eps = jax.random.split(key, 4)

    # batch=2, max_doc_len=8, emb_dim=32, gat_feat_dim=16, multihead=2  (H*O == emb_dim)
    B, N, D, O, H = 2, 8, 32, 16, 2
    params = init_params(k_param, D, O, H)

    doc_sents_h = jax.random.normal(k_x, (B, N, D), jnp.float32)
    doc_len = jnp.array([N, N - 2], jnp.int32)                       # max(doc_len) == N
    adj = (jax.random.uniform(k_adj, (B, N, N)) > 0.3).astype(jnp.float32)
    adj = jnp.maximum(adj, jnp.eye(N, dtype=jnp.float32)[None])      # self loops

    outs = gat_vae_forward(params, doc_sents_h, doc_len, adj, k_eps, H)
    outs = jax.block_until_ready(outs)
    U, b_inv, e_bp, s_bp, rankp, S = outs
    assert U.shape == (B, N, D) and S.shape == (B, N, D)
    assert b_inv.shape == (B, H, N, N)
    assert e_bp.shape == (B, H, N, N) and s_bp.shape == (B, H, N, N)
    assert rankp.shape == (B,)
    print("KERNEL_OK")
</pallas_src>

<mosaic_0001>
module attributes {stable_mosaic.version = 11 : i64} {
  func.func @_encoder_fused_kernel(%arg0: i32, %arg1: memref<4xf32, #tpu.memory_space<smem>>, %arg2: memref<1x8x32xf32, #tpu.memory_space<vmem>>, %arg3: memref<1x8x8xf32, #tpu.memory_space<vmem>>, %arg4: memref<1x2x8x8xf32, #tpu.memory_space<vmem>>, %arg5: memref<32x32xf32, #tpu.memory_space<vmem>>, %arg6: memref<1x32xf32, #tpu.memory_space<vmem>>, %arg7: memref<1x32xf32, #tpu.memory_space<vmem>>, %arg8: memref<1x32xf32, #tpu.memory_space<vmem>>, %arg9: memref<32x32xf32, #tpu.memory_space<vmem>>, %arg10: memref<1x32xf32, #tpu.memory_space<vmem>>, %arg11: memref<32x64xf32, #tpu.memory_space<vmem>>, %arg12: memref<1x64xf32, #tpu.memory_space<vmem>>, %arg13: memref<1x8x32xf32, #tpu.memory_space<vmem>>, %arg14: memref<1x8x32xf32, #tpu.memory_space<vmem>>, %arg15: memref<1x8x32xf32, #tpu.memory_space<vmem>>, %arg16: memref<1x2x8x8xf32, #tpu.memory_space<vmem>>, %arg17: memref<1x2x8x8xf32, #tpu.memory_space<vmem>>, %arg18: memref<1x2x8x8xf32, #tpu.memory_space<vmem>>) attributes {dimension_semantics = [#tpu.dimension_semantics<parallel>], iteration_bounds = array<i64: 2>, scalar_prefetch = 0 : i64, scratch_operands = 0 : i64, tpu.core_type = #tpu.core_type<tc>, window_params = [{transform_indices = @transform_0, window_bounds = array<i64: 4>}, {transform_indices = @transform_1, window_bounds = array<i64: 1, 8, 32>}, {transform_indices = @transform_2, window_bounds = array<i64: 1, 8, 8>}, {transform_indices = @transform_3, window_bounds = array<i64: 1, 2, 8, 8>}, {pipeline_mode = #tpu.pipeline_mode<synchronous>, transform_indices = @transform_4, window_bounds = array<i64: 32, 32>}, {pipeline_mode = #tpu.pipeline_mode<synchronous>, transform_indices = @transform_5, window_bounds = array<i64: 1, 32>}, {pipeline_mode = #tpu.pipeline_mode<synchronous>, transform_indices = @transform_6, window_bounds = array<i64: 1, 32>}, {pipeline_mode = #tpu.pipeline_mode<synchronous>, transform_indices = @transform_7, window_bounds = array<i64: 1, 32>}, {pipeline_mode = #tpu.pipeline_mode<synchronous>, transform_indices = @transform_8, window_bounds = array<i64: 32, 32>}, {pipeline_mode = #tpu.pipeline_mode<synchronous>, transform_indices = @transform_9, window_bounds = array<i64: 1, 32>}, {pipeline_mode = #tpu.pipeline_mode<synchronous>, transform_indices = @transform_10, window_bounds = array<i64: 32, 64>}, {pipeline_mode = #tpu.pipeline_mode<synchronous>, transform_indices = @transform_11, window_bounds = array<i64: 1, 64>}, {transform_indices = @transform_12, window_bounds = array<i64: 1, 8, 32>}, {transform_indices = @transform_13, window_bounds = array<i64: 1, 8, 32>}, {transform_indices = @transform_14, window_bounds = array<i64: 1, 8, 32>}, {transform_indices = @transform_15, window_bounds = array<i64: 1, 2, 8, 8>}, {transform_indices = @transform_16, window_bounds = array<i64: 1, 2, 8, 8>}, {transform_indices = @transform_17, window_bounds = array<i64: 1, 2, 8, 8>}]} {
    %c0 = arith.constant 0 : index
    %c0_0 = arith.constant 0 : index
    %c0_1 = arith.constant 0 : index
    %0 = vector.load %arg2[%c0, %c0_0, %c0_1] : memref<1x8x32xf32, #tpu.memory_space<vmem>>, vector<1x8x32xf32>
    %1 = vector.shape_cast %0 : vector<1x8x32xf32> to vector<8x32xf32>
    %c0_2 = arith.constant 0 : index
    %c0_3 = arith.constant 0 : index
    %c0_4 = arith.constant 0 : index
    %2 = vector.load %arg3[%c0_2, %c0_3, %c0_4] : memref<1x8x8xf32, #tpu.memory_space<vmem>>, vector<1x8x8xf32>
    %3 = vector.shape_cast %2 : vector<1x8x8xf32> to vector<8x8xf32>
    %c0_5 = arith.constant 0 : index
    %c0_6 = arith.constant 0 : index
    %4 = vector.load %arg6[%c0_5, %c0_6] : memref<1x32xf32, #tpu.memory_space<vmem>>, vector<1x32xf32>
    %c0_7 = arith.constant 0 : index
    %c0_8 = arith.constant 0 : index
    %5 = vector.load %arg7[%c0_7, %c0_8] : memref<1x32xf32, #tpu.memory_space<vmem>>, vector<1x32xf32>
    %c0_9 = arith.constant 0 : index
    %6 = memref.load %arg1[%c0_9] : memref<4xf32, #tpu.memory_space<smem>>
    %c1 = arith.constant 1 : index
    %7 = memref.load %arg1[%c1] : memref<4xf32, #tpu.memory_space<smem>>
    %c2 = arith.constant 2 : index
    %8 = memref.load %arg1[%c2] : memref<4xf32, #tpu.memory_space<smem>>
    %c3 = arith.constant 3 : index
    %9 = memref.load %arg1[%c3] : memref<4xf32, #tpu.memory_space<smem>>
    %c0_10 = arith.constant 0 : index
    %c0_11 = arith.constant 0 : index
    %10 = vector.load %arg5[%c0_10, %c0_11] : memref<32x32xf32, #tpu.memory_space<vmem>>, vector<32x32xf32>
    %cst = arith.constant dense<0.000000e+00> : vector<8x32xf32>
    %11 = tpu.matmul %1, %10, %cst {dimension_numbers = #tpu.dot_dimension_numbers<[1], [0], [0], [1], [0, 0, 1, 1], [], []>} : vector<8x32xf32>, vector<32x32xf32>, vector<8x32xf32> -> vector<8x32xf32>
    %12 = math.tanh %11 : vector<8x32xf32>
    %13 = tpu.iota {dimensions = array<i32: 1>} : vector<1x32xi32>
    %cst_12 = arith.constant 0.000000e+00 : f32
    %14 = vector.broadcast %cst_12 : f32 to vector<8x32xf32>
    %c0_i32 = arith.constant 0 : i32
    %15 = vector.broadcast %c0_i32 : i32 to vector<1x32xi32>
    %16 = arith.cmpi sge, %13, %15 : vector<1x32xi32>
    %c16_i32 = arith.constant 16 : i32
    %17 = vector.broadcast %c16_i32 : i32 to vector<1x32xi32>
    %18 = arith.cmpi slt, %13, %17 : vector<1x32xi32>
    %19 = arith.andi %16, %18 : vector<1x32xi1>
    %20 = arith.extui %19 : vector<1x32xi1> to vector<1x32xi32>
    %21 = arith.sitofp %20 : vector<1x32xi32> to vector<1x32xf32>
    %22 = arith.mulf %4, %21 : vector<1x32xf32>
    %23 = vector.broadcast %22 : vector<1x32xf32> to vector<8x32xf32>
    %24 = arith.mulf %12, %23 : vector<8x32xf32>
    %cst_13 = arith.constant dense<0.000000e+00> : vector<8xf32>
    %25 = vector.multi_reduction <add>, %24, %cst_13 [1] : vector<8x32xf32> to vector<8xf32>
    %26 = vector.shape_cast %25 : vector<8xf32> to vector<8x1xf32>
    %27 = arith.mulf %5, %21 : vector<1x32xf32>
    %cst_14 = arith.constant dense<0.000000e+00> : vector<1x8xf32>
    %28 = tpu.matmul %27, %12, %cst_14 {dimension_numbers = #tpu.dot_dimension_numbers<[1], [1], [0], [0], [0, 0, 1, 0], [], []>} : vector<1x32xf32>, vector<8x32xf32>, vector<1x8xf32> -> vector<1x8xf32>
    %29 = vector.broadcast %26 : vector<8x1xf32> to vector<8x8xf32>
    %30 = vector.broadcast %28 : vector<1x8xf32> to vector<8x8xf32>
    %31 = arith.addf %29, %30 : vector<8x8xf32>
    %cst_15 = arith.constant 0.000000e+00 : f32
    %32 = vector.broadcast %cst_15 : f32 to vector<8x8xf32>
    %33 = arith.cmpf ogt, %31, %32 : vector<8x8xf32>
    %cst_16 = arith.constant 2.000000e-01 : f32
    %34 = vector.broadcast %cst_16 : f32 to vector<8x8xf32>
    %35 = arith.mulf %34, %31 : vector<8x8xf32>
    %36 = arith.select %33, %31, %35 : vector<8x8xi1>, vector<8x8xf32>
    %cst_17 = arith.constant 0.000000e+00 : f32
    %37 = vector.broadcast %cst_17 : f32 to vector<8x8xf32>
    %38 = arith.cmpf ogt, %3, %37 : vector<8x8xf32>
    %cst_18 = arith.constant -1.000000e+09 : f32
    %39 = vector.broadcast %cst_18 : f32 to vector<8x8xf32>
    %40 = arith.select %38, %36, %39 : vector<8x8xi1>, vector<8x8xf32>
    %cst_19 = arith.constant dense<0xFF800000> : vector<8xf32>
    %41 = vector.multi_reduction <maximumf>, %40, %cst_19 [1] : vector<8x8xf32> to vector<8xf32>
    %42 = vector.shape_cast %41 : vector<8xf32> to vector<8x1xf32>
    %43 = vector.broadcast %42 : vector<8x1xf32> to vector<8x8xf32>
    %44 = arith.subf %40, %43 : vector<8x8xf32>
    %45 = math.exp %44 : vector<8x8xf32>
    %cst_20 = arith.constant dense<0.000000e+00> : vector<8xf32>
    %46 = vector.multi_reduction <add>, %45, %cst_20 [1] : vector<8x8xf32> to vector<8xf32>
    %47 = vector.shape_cast %46 : vector<8xf32> to vector<8x1xf32>
    %48 = tpu.reciprocal %47 {approx = true} : vector<8x1xf32> -> vector<8x1xf32>
    %49 = vector.broadcast %48 : vector<8x1xf32> to vector<8x8xf32>
    %50 = arith.mulf %45, %49 : vector<8x8xf32>
    %cst_21 = arith.constant 0.000000e+00 : f32
    %51 = vector.shape_cast %19 : vector<1x32xi1> to vector<1x32xi1>
    %52 = vector.broadcast %51 : vector<1x32xi1> to vector<8x32xi1>
    %53 = vector.broadcast %cst_21 : f32 to vector<8x32xf32>
    %54 = arith.select %52, %11, %53 : vector<8x32xi1>, vector<8x32xf32>
    %cst_22 = arith.constant dense<0.000000e+00> : vector<8x32xf32>
    %55 = tpu.matmul %50, %54, %cst_22 {dimension_numbers = #tpu.dot_dimension_numbers<[1], [0], [0], [1], [0, 0, 1, 1], [], []>} : vector<8x8xf32>, vector<8x32xf32>, vector<8x32xf32> -> vector<8x32xf32>
    %56 = arith.addf %14, %55 : vector<8x32xf32>
    %57 = vector.broadcast %6 : f32 to vector<8x8xf32>
    %58 = arith.mulf %57, %50 : vector<8x8xf32>
    %59 = vector.broadcast %7 : f32 to vector<8x8xf32>
    %60 = arith.addf %58, %59 : vector<8x8xf32>
    %61 = vector.broadcast %8 : f32 to vector<8x8xf32>
    %62 = arith.mulf %61, %50 : vector<8x8xf32>
    %63 = vector.broadcast %9 : f32 to vector<8x8xf32>
    %64 = arith.addf %62, %63 : vector<8x8xf32>
    %c0_23 = arith.constant 0 : index
    %c0_24 = arith.constant 0 : index
    %c0_25 = arith.constant 0 : index
    %c0_26 = arith.constant 0 : index
    %65 = vector.load %arg16[%c0_23, %c0_24, %c0_25, %c0_26] : memref<1x2x8x8xf32, #tpu.memory_space<vmem>>, vector<1x1x8x8xf32>
    %66 = vector.shape_cast %65 : vector<1x1x8x8xf32> to vector<8x8xf32>
    %67 = vector.shape_cast %60 : vector<8x8xf32> to vector<1x1x8x8xf32>
    tpu.vector_store %arg16[%c0_23, %c0_24, %c0_25, %c0_26], %67 {strides = array<i32>} : memref<1x2x8x8xf32, #tpu.memory_space<vmem>>, vector<1x1x8x8xf32>,
    %c0_27 = arith.constant 0 : index
    %c0_28 = arith.constant 0 : index
    %c0_29 = arith.constant 0 : index
    %c0_30 = arith.constant 0 : index
    %68 = vector.load %arg17[%c0_27, %c0_28, %c0_29, %c0_30] : memref<1x2x8x8xf32, #tpu.memory_space<vmem>>, vector<1x1x8x8xf32>
    %69 = vector.shape_cast %68 : vector<1x1x8x8xf32> to vector<8x8xf32>
    %70 = vector.shape_cast %64 : vector<8x8xf32> to vector<1x1x8x8xf32>
    tpu.vector_store %arg17[%c0_27, %c0_28, %c0_29, %c0_30], %70 {strides = array<i32>} : memref<1x2x8x8xf32, #tpu.memory_space<vmem>>, vector<1x1x8x8xf32>,
    %c0_31 = arith.constant 0 : index
    %c0_32 = arith.constant 0 : index
    %c0_33 = arith.constant 0 : index
    %c0_34 = arith.constant 0 : index
    %71 = vector.load %arg4[%c0_31, %c0_32, %c0_33, %c0_34] : memref<1x2x8x8xf32, #tpu.memory_space<vmem>>, vector<1x1x8x8xf32>
    %72 = vector.shape_cast %71 : vector<1x1x8x8xf32> to vector<8x8xf32>
    %cst_35 = arith.constant 5.000000e-01 : f32
    %73 = vector.broadcast %cst_35 : f32 to vector<8x8xf32>
    %74 = arith.mulf %73, %64 : vector<8x8xf32>
    %75 = math.exp %74 : vector<8x8xf32>
    %76 = arith.mulf %72, %75 : vector<8x8xf32>
    %77 = arith.addf %76, %60 : vector<8x8xf32>
    %cst_36 = arith.constant 0.000000e+00 : f32
    %78 = vector.broadcast %cst_36 : f32 to vector<8x8xf32>
    %79 = arith.cmpf oeq, %50, %78 : vector<8x8xf32>
    %80 = arith.select %79, %50, %77 : vector<8x8xi1>, vector<8x8xf32>
    %c0_37 = arith.constant 0 : index
    %c0_38 = arith.constant 0 : index
    %c0_39 = arith.constant 0 : index
    %c0_40 = arith.constant 0 : index
    %81 = vector.load %arg18[%c0_37, %c0_38, %c0_39, %c0_40] : memref<1x2x8x8xf32, #tpu.memory_space<vmem>>, vector<1x1x8x8xf32>
    %82 = vector.shape_cast %81 : vector<1x1x8x8xf32> to vector<8x8xf32>
    %83 = vector.shape_cast %80 : vector<8x8xf32> to vector<1x1x8x8xf32>
    tpu.vector_store %arg18[%c0_37, %c0_38, %c0_39, %c0_40], %83 {strides = array<i32>} : memref<1x2x8x8xf32, #tpu.memory_space<vmem>>, vector<1x1x8x8xf32>,
    %c16_i32_41 = arith.constant 16 : i32
    %84 = vector.broadcast %c16_i32_41 : i32 to vector<1x32xi32>
    %85 = arith.cmpi sge, %13, %84 : vector<1x32xi32>
    %c32_i32 = arith.constant 32 : i32
    %86 = vector.broadcast %c32_i32 : i32 to vector<1x32xi32>
    %87 = arith.cmpi slt, %13, %86 : vector<1x32xi32>
    %88 = arith.andi %85, %87 : vector<1x32xi1>
    %89 = arith.extui %88 : vector<1x32xi1> to vector<1x32xi32>
    %90 = arith.sitofp %89 : vector<1x32xi32> to vector<1x32xf32>
    %91 = arith.mulf %4, %90 : vector<1x32xf32>
    %92 = vector.broadcast %91 : vector<1x32xf32> to vector<8x32xf32>
    %93 = arith.mulf %12, %92 : vector<8x32xf32>
    %cst_42 = arith.constant dense<0.000000e+00> : vector<8xf32>
    %94 = vector.multi_reduction <add>, %93, %cst_42 [1] : vector<8x32xf32> to vector<8xf32>
    %95 = vector.shape_cast %94 : vector<8xf32> to vector<8x1xf32>
    %96 = arith.mulf %5, %90 : vector<1x32xf32>
    %cst_43 = arith.constant dense<0.000000e+00> : vector<1x8xf32>
    %97 = tpu.matmul %96, %12, %cst_43 {dimension_numbers = #tpu.dot_dimension_numbers<[1], [1], [0], [0], [0, 0, 1, 0], [], []>} : vector<1x32xf32>, vector<8x32xf32>, vector<1x8xf32> -> vector<1x8xf32>
    %98 = vector.broadcast %95 : vector<8x1xf32> to vector<8x8xf32>
    %99 = vector.broadcast %97 : vector<1x8xf32> to vector<8x8xf32>
    %100 = arith.addf %98, %99 : vector<8x8xf32>
    %cst_44 = arith.constant 0.000000e+00 : f32
    %101 = vector.broadcast %cst_44 : f32 to vector<8x8xf32>
    %102 = arith.cmpf ogt, %100, %101 : vector<8x8xf32>
    %cst_45 = arith.constant 2.000000e-01 : f32
    %103 = vector.broadcast %cst_45 : f32 to vector<8x8xf32>
    %104 = arith.mulf %103, %100 : vector<8x8xf32>
    %105 = arith.select %102, %100, %104 : vector<8x8xi1>, vector<8x8xf32>
    %cst_46 = arith.constant 0.000000e+00 : f32
    %106 = vector.broadcast %cst_46 : f32 to vector<8x8xf32>
    %107 = arith.cmpf ogt, %3, %106 : vector<8x8xf32>
    %cst_47 = arith.constant -1.000000e+09 : f32
    %108 = vector.broadcast %cst_47 : f32 to vector<8x8xf32>
    %109 = arith.select %107, %105, %108 : vector<8x8xi1>, vector<8x8xf32>
    %cst_48 = arith.constant dense<0xFF800000> : vector<8xf32>
    %110 = vector.multi_reduction <maximumf>, %109, %cst_48 [1] : vector<8x8xf32> to vector<8xf32>
    %111 = vector.shape_cast %110 : vector<8xf32> to vector<8x1xf32>
    %112 = vector.broadcast %111 : vector<8x1xf32> to vector<8x8xf32>
    %113 = arith.subf %109, %112 : vector<8x8xf32>
    %114 = math.exp %113 : vector<8x8xf32>
    %cst_49 = arith.constant dense<0.000000e+00> : vector<8xf32>
    %115 = vector.multi_reduction <add>, %114, %cst_49 [1] : vector<8x8xf32> to vector<8xf32>
    %116 = vector.shape_cast %115 : vector<8xf32> to vector<8x1xf32>
    %117 = tpu.reciprocal %116 {approx = true} : vector<8x1xf32> -> vector<8x1xf32>
    %118 = vector.broadcast %117 : vector<8x1xf32> to vector<8x8xf32>
    %119 = arith.mulf %114, %118 : vector<8x8xf32>
    %cst_50 = arith.constant 0.000000e+00 : f32
    %120 = vector.shape_cast %88 : vector<1x32xi1> to vector<1x32xi1>
    %121 = vector.broadcast %120 : vector<1x32xi1> to vector<8x32xi1>
    %122 = vector.broadcast %cst_50 : f32 to vector<8x32xf32>
    %123 = arith.select %121, %11, %122 : vector<8x32xi1>, vector<8x32xf32>
    %cst_51 = arith.constant dense<0.000000e+00> : vector<8x32xf32>
    %124 = tpu.matmul %119, %123, %cst_51 {dimension_numbers = #tpu.dot_dimension_numbers<[1], [0], [0], [1], [0, 0, 1, 1], [], []>} : vector<8x8xf32>, vector<8x32xf32>, vector<8x32xf32> -> vector<8x32xf32>
    %125 = arith.addf %56, %124 : vector<8x32xf32>
    %126 = vector.broadcast %6 : f32 to vector<8x8xf32>
    %127 = arith.mulf %126, %119 : vector<8x8xf32>
    %128 = vector.broadcast %7 : f32 to vector<8x8xf32>
    %129 = arith.addf %127, %128 : vector<8x8xf32>
    %130 = vector.broadcast %8 : f32 to vector<8x8xf32>
    %131 = arith.mulf %130, %119 : vector<8x8xf32>
    %132 = vector.broadcast %9 : f32 to vector<8x8xf32>
    %133 = arith.addf %131, %132 : vector<8x8xf32>
    %c0_52 = arith.constant 0 : index
    %c1_53 = arith.constant 1 : index
    %c0_54 = arith.constant 0 : index
    %c0_55 = arith.constant 0 : index
    %134 = vector.load %arg16[%c0_52, %c1_53, %c0_54, %c0_55] : memref<1x2x8x8xf32, #tpu.memory_space<vmem>>, vector<1x1x8x8xf32>
    %135 = vector.shape_cast %134 : vector<1x1x8x8xf32> to vector<8x8xf32>
    %136 = vector.shape_cast %129 : vector<8x8xf32> to vector<1x1x8x8xf32>
    tpu.vector_store %arg16[%c0_52, %c1_53, %c0_54, %c0_55], %136 {strides = array<i32>} : memref<1x2x8x8xf32, #tpu.memory_space<vmem>>, vector<1x1x8x8xf32>,
    %c0_56 = arith.constant 0 : index
    %c1_57 = arith.constant 1 : index
    %c0_58 = arith.constant 0 : index
    %c0_59 = arith.constant 0 : index
    %137 = vector.load %arg17[%c0_56, %c1_57, %c0_58, %c0_59] : memref<1x2x8x8xf32, #tpu.memory_space<vmem>>, vector<1x1x8x8xf32>
    %138 = vector.shape_cast %137 : vector<1x1x8x8xf32> to vector<8x8xf32>
    %139 = vector.shape_cast %133 : vector<8x8xf32> to vector<1x1x8x8xf32>
    tpu.vector_store %arg17[%c0_56, %c1_57, %c0_58, %c0_59], %139 {strides = array<i32>} : memref<1x2x8x8xf32, #tpu.memory_space<vmem>>, vector<1x1x8x8xf32>,
    %c0_60 = arith.constant 0 : index
    %c1_61 = arith.constant 1 : index
    %c0_62 = arith.constant 0 : index
    %c0_63 = arith.constant 0 : index
    %140 = vector.load %arg4[%c0_60, %c1_61, %c0_62, %c0_63] : memref<1x2x8x8xf32, #tpu.memory_space<vmem>>, vector<1x1x8x8xf32>
    %141 = vector.shape_cast %140 : vector<1x1x8x8xf32> to vector<8x8xf32>
    %cst_64 = arith.constant 5.000000e-01 : f32
    %142 = vector.broadcast %cst_64 : f32 to vector<8x8xf32>
    %143 = arith.mulf %142, %133 : vector<8x8xf32>
    %144 = math.exp %143 : vector<8x8xf32>
    %145 = arith.mulf %141, %144 : vector<8x8xf32>
    %146 = arith.addf %145, %129 : vector<8x8xf32>
    %cst_65 = arith.constant 0.000000e+00 : f32
    %147 = vector.broadcast %cst_65 : f32 to vector<8x8xf32>
    %148 = arith.cmpf oeq, %119, %147 : vector<8x8xf32>
    %149 = arith.select %148, %119, %146 : vector<8x8xi1>, vector<8x8xf32>
    %c0_66 = arith.constant 0 : index
    %c1_67 = arith.constant 1 : index
    %c0_68 = arith.constant 0 : index
    %c0_69 = arith.constant 0 : index
    %150 = vector.load %arg18[%c0_66, %c1_67, %c0_68, %c0_69] : memref<1x2x8x8xf32, #tpu.memory_space<vmem>>, vector<1x1x8x8xf32>
    %151 = vector.shape_cast %150 : vector<1x1x8x8xf32> to vector<8x8xf32>
    %152 = vector.shape_cast %149 : vector<8x8xf32> to vector<1x1x8x8xf32>
    tpu.vector_store %arg18[%c0_66, %c1_67, %c0_68, %c0_69], %152 {strides = array<i32>} : memref<1x2x8x8xf32, #tpu.memory_space<vmem>>, vector<1x1x8x8xf32>,
    %c0_70 = arith.constant 0 : index
    %c0_71 = arith.constant 0 : index
    %153 = vector.load %arg8[%c0_70, %c0_71] : memref<1x32xf32, #tpu.memory_space<vmem>>, vector<1x32xf32>
    %154 = vector.broadcast %153 : vector<1x32xf32> to vector<8x32xf32>
    %155 = arith.addf %125, %154 : vector<8x32xf32>
    %cst_72 = arith.constant 0.000000e+00 : f32
    %156 = vector.broadcast %cst_72 : f32 to vector<8x32xf32>
    %157 = arith.cmpf ogt, %155, %156 : vector<8x32xf32>
    %cst_73 = arith.constant 0.000000e+00 : f32
    %158 = vector.broadcast %cst_73 : f32 to vector<8x32xf32>
    %159 = arith.minimumf %155, %158 : vector<8x32xf32>
    %160 = math.exp %159 : vector<8x32xf32>
    %cst_74 = arith.constant 1.000000e+00 : f32
    %161 = vector.broadcast %cst_74 : f32 to vector<8x32xf32>
    %162 = arith.subf %160, %161 : vector<8x32xf32>
    %163 = arith.select %157, %155, %162 : vector<8x32xi1>, vector<8x32xf32>
    %c0_75 = arith.constant 0 : index
    %c0_76 = arith.constant 0 : index
    %164 = vector.load %arg9[%c0_75, %c0_76] : memref<32x32xf32, #tpu.memory_space<vmem>>, vector<32x32xf32>
    %cst_77 = arith.constant dense<0.000000e+00> : vector<8x32xf32>
    %165 = tpu.matmul %1, %164, %cst_77 {dimension_numbers = #tpu.dot_dimension_numbers<[1], [0], [0], [1], [0, 0, 1, 1], [], []>} : vector<8x32xf32>, vector<32x32xf32>, vector<8x32xf32> -> vector<8x32xf32>
    %c0_78 = arith.constant 0 : index
    %c0_79 = arith.constant 0 : index
    %166 = vector.load %arg10[%c0_78, %c0_79] : memref<1x32xf32, #tpu.memory_space<vmem>>, vector<1x32xf32>
    %167 = vector.broadcast %166 : vector<1x32xf32> to vector<8x32xf32>
    %168 = arith.addf %165, %167 : vector<8x32xf32>
    %169 = arith.negf %168 : vector<8x32xf32>
    %170 = math.exp %169 : vector<8x32xf32>
    %cst_80 = arith.constant 1.000000e+00 : f32
    %171 = vector.broadcast %cst_80 : f32 to vector<8x32xf32>
    %172 = arith.addf %171, %170 : vector<8x32xf32>
    %173 = arith.divf %171, %172 : vector<8x32xf32>
    %174 = arith.mulf %173, %163 : vector<8x32xf32>
    %cst_81 = arith.constant 1.000000e+00 : f32
    %175 = vector.broadcast %cst_81 : f32 to vector<8x32xf32>
    %176 = arith.subf %175, %173 : vector<8x32xf32>
    %177 = arith.mulf %176, %1 : vector<8x32xf32>
    %178 = arith.addf %174, %177 : vector<8x32xf32>
    %c0_82 = arith.constant 0 : index
    %c0_83 = arith.constant 0 : index
    %179 = vector.load %arg11[%c0_82, %c0_83] : memref<32x64xf32, #tpu.memory_space<vmem>>, vector<32x64xf32>
    %cst_84 = arith.constant dense<0.000000e+00> : vector<8x64xf32>
    %180 = tpu.matmul %178, %179, %cst_84 {dimension_numbers = #tpu.dot_dimension_numbers<[1], [0], [0], [1], [0, 0, 1, 1], [], []>} : vector<8x32xf32>, vector<32x64xf32>, vector<8x64xf32> -> vector<8x64xf32>
    %c0_85 = arith.constant 0 : index
    %c0_86 = arith.constant 0 : index
    %181 = vector.load %arg12[%c0_85, %c0_86] : memref<1x64xf32, #tpu.memory_space<vmem>>, vector<1x64xf32>
    %182 = vector.broadcast %181 : vector<1x64xf32> to vector<8x64xf32>
    %183 = arith.addf %180, %182 : vector<8x64xf32>
    %184 = vector.extract_strided_slice %183 {offsets = [0, 0], sizes = [8, 32], strides = [1, 1]} : vector<8x64xf32> to vector<8x32xf32>
    %185 = vector.extract_strided_slice %183 {offsets = [0, 32], sizes = [8, 32], strides = [1, 1]} : vector<8x64xf32> to vector<8x32xf32>
    %c0_87 = arith.constant 0 : index
    %c0_88 = arith.constant 0 : index
    %c0_89 = arith.constant 0 : index
    %186 = vector.load %arg13[%c0_87, %c0_88, %c0_89] : memref<1x8x32xf32, #tpu.memory_space<vmem>>, vector<1x8x32xf32>
    %187 = vector.shape_cast %186 : vector<1x8x32xf32> to vector<8x32xf32>
    %188 = vector.shape_cast %184 : vector<8x32xf32> to vector<1x8x32xf32>
    tpu.vector_store %arg13[%c0_87, %c0_88, %c0_89], %188 {strides = array<i32>} : memref<1x8x32xf32, #tpu.memory_space<vmem>>, vector<1x8x32xf32>,
    %c0_90 = arith.constant 0 : index
    %c0_91 = arith.constant 0 : index
    %c0_92 = arith.constant 0 : index
    %189 = vector.load %arg14[%c0_90, %c0_91, %c0_92] : memref<1x8x32xf32, #tpu.memory_space<vmem>>, vector<1x8x32xf32>
    %190 = vector.shape_cast %189 : vector<1x8x32xf32> to vector<8x32xf32>
    %191 = vector.shape_cast %185 : vector<8x32xf32> to vector<1x8x32xf32>
    tpu.vector_store %arg14[%c0_90, %c0_91, %c0_92], %191 {strides = array<i32>} : memref<1x8x32xf32, #tpu.memory_space<vmem>>, vector<1x8x32xf32>,
    %192 = arith.negf %1 : vector<8x32xf32>
    %193 = math.exp %192 : vector<8x32xf32>
    %cst_93 = arith.constant 1.000000e+00 : f32
    %194 = vector.broadcast %cst_93 : f32 to vector<8x32xf32>
    %195 = arith.addf %194, %193 : vector<8x32xf32>
    %196 = arith.divf %194, %195 : vector<8x32xf32>
    %197 = arith.negf %185 : vector<8x32xf32>
    %198 = math.exp %197 : vector<8x32xf32>
    %cst_94 = arith.constant 1.000000e+00 : f32
    %199 = vector.broadcast %cst_94 : f32 to vector<8x32xf32>
    %200 = arith.addf %199, %198 : vector<8x32xf32>
    %201 = arith.divf %199, %200 : vector<8x32xf32>
    %202 = arith.mulf %196, %201 : vector<8x32xf32>
    %cst_95 = arith.constant dense<0.000000e+00> : vector<32xf32>
    %203 = vector.multi_reduction <add>, %202, %cst_95 [0] : vector<8x32xf32> to vector<32xf32>
    %204 = vector.shape_cast %203 : vector<32xf32> to vector<1x32xf32>
    %205 = tpu.reciprocal %204 {approx = true} : vector<1x32xf32> -> vector<1x32xf32>
    %206 = vector.broadcast %205 : vector<1x32xf32> to vector<8x32xf32>
    %207 = arith.mulf %202, %206 : vector<8x32xf32>
    %208 = arith.mulf %207, %1 : vector<8x32xf32>
    %c0_96 = arith.constant 0 : index
    %c0_97 = arith.constant 0 : index
    %c0_98 = arith.constant 0 : index
    %209 = vector.load %arg15[%c0_96, %c0_97, %c0_98] : memref<1x8x32xf32, #tpu.memory_space<vmem>>, vector<1x8x32xf32>
    %210 = vector.shape_cast %209 : vector<1x8x32xf32> to vector<8x32xf32>
    %211 = vector.shape_cast %208 : vector<8x32xf32> to vector<1x8x32xf32>
    tpu.vector_store %arg15[%c0_96, %c0_97, %c0_98], %211 {strides = array<i32>} : memref<1x8x32xf32, #tpu.memory_space<vmem>>, vector<1x8x32xf32>,
    return
  }
  func.func @transform_0(%arg0: i32) -> i32 {
    %c0_i32 = arith.constant 0 : i32
    %c0_i32_0 = arith.constant 0 : i32
    return %c0_i32 : i32
  }
  func.func @transform_1(%arg0: i32) -> (i32, i32, i32) {
    %c0_i32 = arith.constant 0 : i32
    %c0_i32_0 = arith.constant 0 : i32
    %c0_i32_1 = arith.constant 0 : i32
    return %arg0, %c0_i32, %c0_i32_0 : i32, i32, i32
  }
  func.func @transform_2(%arg0: i32) -> (i32, i32, i32) {
    %c0_i32 = arith.constant 0 : i32
    %c0_i32_0 = arith.constant 0 : i32
    %c0_i32_1 = arith.constant 0 : i32
    return %arg0, %c0_i32, %c0_i32_0 : i32, i32, i32
  }
  func.func @transform_3(%arg0: i32) -> (i32, i32, i32, i32) {
    %c0_i32 = arith.constant 0 : i32
    %c0_i32_0 = arith.constant 0 : i32
    %c0_i32_1 = arith.constant 0 : i32
    %c0_i32_2 = arith.constant 0 : i32
    return %arg0, %c0_i32, %c0_i32_0, %c0_i32_1 : i32, i32, i32, i32
  }
  func.func @transform_4(%arg0: i32) -> (i32, i32) {
    %c0_i32 = arith.constant 0 : i32
    %c0_i32_0 = arith.constant 0 : i32
    %c0_i32_1 = arith.constant 0 : i32
    return %c0_i32, %c0_i32_0 : i32, i32
  }
  func.func @transform_5(%arg0: i32) -> (i32, i32) {
    %c0_i32 = arith.constant 0 : i32
    %c0_i32_0 = arith.constant 0 : i32
    %c0_i32_1 = arith.constant 0 : i32
    return %c0_i32, %c0_i32_0 : i32, i32
  }
  func.func @transform_6(%arg0: i32) -> (i32, i32) {
    %c0_i32 = arith.constant 0 : i32
    %c0_i32_0 = arith.constant 0 : i32
    %c0_i32_1 = arith.constant 0 : i32
    return %c0_i32, %c0_i32_0 : i32, i32
  }
  func.func @transform_7(%arg0: i32) -> (i32, i32) {
    %c0_i32 = arith.constant 0 : i32
    %c0_i32_0 = arith.constant 0 : i32
    %c0_i32_1 = arith.constant 0 : i32
    return %c0_i32, %c0_i32_0 : i32, i32
  }
  func.func @transform_8(%arg0: i32) -> (i32, i32) {
    %c0_i32 = arith.constant 0 : i32
    %c0_i32_0 = arith.constant 0 : i32
    %c0_i32_1 = arith.constant 0 : i32
    return %c0_i32, %c0_i32_0 : i32, i32
  }
  func.func @transform_9(%arg0: i32) -> (i32, i32) {
    %c0_i32 = arith.constant 0 : i32
    %c0_i32_0 = arith.constant 0 : i32
    %c0_i32_1 = arith.constant 0 : i32
    return %c0_i32, %c0_i32_0 : i32, i32
  }
  func.func @transform_10(%arg0: i32) -> (i32, i32) {
    %c0_i32 = arith.constant 0 : i32
    %c0_i32_0 = arith.constant 0 : i32
    %c0_i32_1 = arith.constant 0 : i32
    return %c0_i32, %c0_i32_0 : i32, i32
  }
  func.func @transform_11(%arg0: i32) -> (i32, i32) {
    %c0_i32 = arith.constant 0 : i32
    %c0_i32_0 = arith.constant 0 : i32
    %c0_i32_1 = arith.constant 0 : i32
    return %c0_i32, %c0_i32_0 : i32, i32
  }
  func.func @transform_12(%arg0: i32) -> (i32, i32, i32) {
    %c0_i32 = arith.constant 0 : i32
    %c0_i32_0 = arith.constant 0 : i32
    %c0_i32_1 = arith.constant 0 : i32
    return %arg0, %c0_i32, %c0_i32_0 : i32, i32, i32
  }
  func.func @transform_13(%arg0: i32) -> (i32, i32, i32) {
    %c0_i32 = arith.constant 0 : i32
    %c0_i32_0 = arith.constant 0 : i32
    %c0_i32_1 = arith.constant 0 : i32
    return %arg0, %c0_i32, %c0_i32_0 : i32, i32, i32
  }
  func.func @transform_14(%arg0: i32) -> (i32, i32, i32) {
    %c0_i32 = arith.constant 0 : i32
    %c0_i32_0 = arith.constant 0 : i32
    %c0_i32_1 = arith.constant 0 : i32
    return %arg0, %c0_i32, %c0_i32_0 : i32, i32, i32
  }
  func.func @transform_15(%arg0: i32) -> (i32, i32, i32, i32) {
    %c0_i32 = arith.constant 0 : i32
    %c0_i32_0 = arith.constant 0 : i32
    %c0_i32_1 = arith.constant 0 : i32
    %c0_i32_2 = arith.constant 0 : i32
    return %arg0, %c0_i32, %c0_i32_0, %c0_i32_1 : i32, i32, i32, i32
  }
  func.func @transform_16(%arg0: i32) -> (i32, i32, i32, i32) {
    %c0_i32 = arith.constant 0 : i32
    %c0_i32_0 = arith.constant 0 : i32
    %c0_i32_1 = arith.constant 0 : i32
    %c0_i32_2 = arith.constant 0 : i32
    return %arg0, %c0_i32, %c0_i32_0, %c0_i32_1 : i32, i32, i32, i32
  }
  func.func @transform_17(%arg0: i32) -> (i32, i32, i32, i32) {
    %c0_i32 = arith.constant 0 : i32
    %c0_i32_0 = arith.constant 0 : i32
    %c0_i32_1 = arith.constant 0 : i32
    %c0_i32_2 = arith.constant 0 : i32
    return %arg0, %c0_i32, %c0_i32_0, %c0_i32_1 : i32, i32, i32, i32
  }
}

</mosaic_0001>

<bundles_post_ra>
// kernel: tpu_custom_call.1
= control target key start
LH: loop header
LB: loop body
LE: loop exit
PB: predicated region body
PF: predicated region fallthrough
CT: control target
= control target key end

     0   :  { %s2770_s0 = inlined_call_operand.hbm [shape: f32[4], index: 0, kind: input, shape index: {}]   ;;  %s2771_s1 = inlined_call_operand.hbm [shape: f32[2,8,32], index: 1, kind: input, shape index: {}]   ;;  %s2772_s2 = inlined_call_operand.hbm [shape: f32[2,8,8], index: 2, kind: input, shape index: {}]   ;;  %s2773_s3 = inlined_call_operand.hbm [shape: f32[2,2,8,8], index: 3, kind: input, shape index: {}]   ;;  %s2774_s4 = inlined_call_operand.hbm [shape: f32[32,32], index: 4, kind: input, shape index: {}]   ;;  %s2775_s5 = inlined_call_operand.vmem [shape: f32[1,32], index: 5, kind: input, shape index: {}]   ;;  %s2776_s6 = inlined_call_operand.vmem [shape: f32[1,32], index: 6, kind: input, shape index: {}]   ;;  %s2777_s7 = inlined_call_operand.vmem [shape: f32[1,32], index: 7, kind: input, shape index: {}]   ;;  %s2778_s8 = inlined_call_operand.hbm [shape: f32[32,32], index: 8, kind: input, shape index: {}]   ;;  %s2779_s9 = inlined_call_operand.vmem [shape: f32[1,32], index: 9, kind: input, shape index: {}]   ;;  %s2780_s10 = inlined_call_operand.hbm [shape: f32[32,64], index: 10, kind: input, shape index: {}]   ;;  %s2781_s11 = inlined_call_operand.vmem [shape: f32[1,64], index: 11, kind: input, shape index: {}]   ;;  %s2782_s12 = inlined_call_operand.hbm [shape: f32[2,8,32], index: 12, kind: output, shape index: {0}]   ;;  %s2783_s13 = inlined_call_operand.hbm [shape: f32[2,8,32], index: 13, kind: output, shape index: {1}]   ;;  %s2784_s14 = inlined_call_operand.hbm [shape: f32[2,8,32], index: 14, kind: output, shape index: {2}]   ;;  %s2785_s15 = inlined_call_operand.hbm [shape: f32[2,2,8,8], index: 15, kind: output, shape index: {3}]   ;;  %s2786_s16 = inlined_call_operand.hbm [shape: f32[2,2,8,8], index: 16, kind: output, shape index: {4}]   ;;  %s2787_s17 = inlined_call_operand.hbm [shape: f32[2,2,8,8], index: 17, kind: output, shape index: {5}]  }
   0x1   :  { %2814 = sst [smem:[#allocation39_spill]] %s2770_s0 }
   0x2   :  { %2815 = sst [smem:[#allocation40_spill]] %s2771_s1 }
   0x3   :  { %2816 = sst [smem:[#allocation41_spill]] %s2772_s2 }
   0x4   :  { %2817 = sst [smem:[#allocation42_spill]] %s2773_s3 }
   0x5   :  { %2818 = sst [smem:[#allocation43_spill]] %s2774_s4 }
   0x6   :  { %2819 = sst [smem:[#allocation44_spill]] %s2775_s5 }
   0x7   :  { %2820 = sst [smem:[#allocation45_spill]] %s2776_s6 }
   0x8   :  { %2821 = sst [smem:[#allocation46_spill]] %s2778_s8 }
   0x9   :  { %2822 = sst [smem:[#allocation47_spill]] %s2780_s10 }
   0xa   :  { %2823 = sst [smem:[#allocation48_spill]] %s2781_s11 }
   0xb   :  { %2824 = sst [smem:[#allocation49_spill]] %s2782_s12 }
   0xc   :  { %2825 = sst [smem:[#allocation50_spill]] %s2783_s13 }
   0xd   :  { %2826 = sst [smem:[#allocation51_spill]] %s2784_s14 }
   0xe   :  { %2827 = sst [smem:[#allocation52_spill]] %s2785_s15 }
   0xf   :  { %2828 = sst [smem:[#allocation53_spill]] %s2786_s16 }
  0x10   :  { %2829 = sst [smem:[#allocation54_spill]] %s2787_s17 }
  0x11   :  { %23 = vsyncpa [#allocation5], 0 }
  0x12   :  { %24 = vsyncpa [#allocation3], 0 }
  0x13   :  { %26 = vsyncpa [#allocation3 + $0x1], 0 }
  0x14   :  { %27 = vsyncpa [#allocation8], 0 }
  0x15   :  { %29 = vsyncpa [#allocation8 + $0x1], 0 }
  0x16   :  { %30 = vsyncpa [#allocation11], 0 }
  0x17   :  { %31 = vsyncpa [#allocation14], 0 }
  0x18   :  { %32 = vsyncpa [#allocation4], 0 }
  0x19   :  { %34 = vsyncpa [#allocation4 + $0x1], 0 }
  0x1a   :  { %35 = vsyncpa [#allocation17], 0 }
  0x1b   :  { %37 = vsyncpa [#allocation17 + $0x1], 0 }
  0x1c   :  { %38 = vsyncpa [#allocation20], 0 }
  0x1d   :  { %40 = vsyncpa [#allocation20 + $0x1], 0 }
  0x1e   :  { %41 = vsyncpa [#allocation23], 0 }
  0x1f   :  { %43 = vsyncpa [#allocation23 + $0x1], 0  ;;  %s2344_s24 = smov 0   ;;  %s2346_s25 = smov 0  }
  0x20   :  { %s2348_s26 = smov 0   ;;  %s2350_s27 = smov 0  }
  0x21 LB: > { %2830 = sst [smem:[#allocation33_spill]] %s2230_s24  ;;  %s2368_s30 = sadd.s32 4294967295, %s2242_s27   ;;  %s2242_s27 = sphi %s2350_s27, %s2878_s27   ;;  %s2238_s26 = sphi %s2348_s26, %s2880_s26   ;;  %s2234_s25 = sphi %s2346_s25, %s2882_s25   ;;  %s2230_s24 = sphi %s2344_s24, %s2881_s24  }
  0x22   : > { %2831 = sst [smem:[#allocation34_spill]] %s2238_s26  ;;  %p1580_p0 = scmp.ge.s32.totalorder %s2242_s27, 1 }
  0x23   : > { %s2832_s4 = sld [smem:[#allocation43_spill]]  ;;  %p2806_p1 = scmp.eq.s32.totalorder %s2368_s30, 0 }
  0x24   : > { %p477_p2 = scmp.lt.s32.totalorder %s2242_s27, 3  ;;  %s2244_s19 = smov [#allocation10]  }
  0x25   : > { %s500_s1 = sshll.u32 %s2244_s19, 4  ;;  %s2789_s21 = smov 128   ;;  %s501_s1 = int_to_ptr.vmem [resolvable:$true] %s500_s1 }
  0x26   : > { %p2373_p3 = pnand %p1580_p0, %p477_p2  ;;  %s2791_s22 = smov 8  }
  0x27   : > { %s2795_s23 = sadd.s32 4294967294, %s2242_s27   ;;  %s2393_s28 = sadd.s32 1, %s2242_s27  }
  0x28   : > { %p1686_p4 = pneg %p2373_p3  ;;  %2835 = sst [smem:[#allocation35_spill]] %s2393_s28 }
  0x29   : > { %s498_s0 = sshll.u32 %s2832_s4, 4  ;;  %s77_s29 = sadd.s32 1, %s2238_s26  ;;  %s499_s0 = int_to_ptr.hbm [resolvable:$true] %s498_s0 }
  0x2a   : > { %p2382_p6 = pnand %p1686_p4, %p2806_p1  ;;  %s74_s19 = ssub.s32 %s2242_s27, %s2393_s28 }
  0x2b   : > { %p84_p7 = scmp.ne.s32.totalorder %s2238_s26, %s2234_s25  ;;  %p75_p8 = scmp.eq.s32.totalorder %s74_s19, 0 }
  0x2c   : > { %1692 = dma.hbm_to_vmem [thread:$0]  (!%p2382_p6), %s499_s0, 512, %s501_s1, [#allocation11], %s2789_s21, %s2789_s21, %s2791_s22  }
  0x2d   : > { %p85_p9 = scmp.eq.s32.totalorder %s2242_s27, 0  ;;  %p90_p10 = scmp.ne.s32.totalorder %s2234_s25, %s2230_s24 }
  0x2e   : > { %p334_p11 = scmp.eq.s32.totalorder %s2368_s30, 1  ;;  %p340_p2 = scmp.eq.s32.totalorder %s2795_s23, 1 }
  0x2f   : > { %s2405_s4 = scalar_select %p75_p8, %s2238_s26, %s77_s29  }
  0x30   : > { %p86_p12 = por %p85_p9, %p84_p7  ;;  %p2409_p13 = por %p2806_p1, %p90_p10 }
  0x31   : > { %2836 = sst [smem:[#allocation36_spill]] %s2405_s4  ;;  %p2413_p0 = por %p334_p11, %p84_p7 }
  0x32   : > { %p1732_p4 = scmp.lt.s32.totalorder %s2242_s27, 2  ;;  %s2421_s19 = sand.u32 1, %s2238_s26  }
  0x33   : > { %s2838_s1 = scalar_select %p2413_p0, 1, 0 }
  0x34   : > { %p2423_p8 = por %p340_p2, %p90_p10  ;;  %s2805_s21 = sshll.u32 %s2421_s19, 3 }
  0x35   : > { %2839 = sst [smem:[#allocation37_spill]] %s2838_s1  ;;  %s2807_s22 = sshll.u32 %s2242_s27, 3 }
  0x36   : > { %s2840_s29 = scalar_select %p2423_p8, 1, 0 }
  0x37   : > { %p2429_p9 = pnand %p1732_p4, %p86_p12  ;;  %s576_s28 = sand.u32 1, %s2242_s27  }
  0x38   : > { %2841 = sst [smem:[#allocation38_spill]] %s2840_s29  ;;  %s580_s14 = scalar_lea.vmem [#allocation7], %s2805_s21 }
  0x39   : > { %s2843_s2 = sld [smem:[#allocation41_spill]]  ;;  %s588_s13 = sshll.u32 %s580_s14, 4  ;;  %s589_s13 = int_to_ptr.vmem [resolvable:$true] %s588_s13 }
  0x3a   : > { %s1590_s29 = sshll.u32 %s2421_s19, 4  ;;  %s2442_s16 = scalar_lea.sflag [#allocation8], %s576_s28 }
  0x3b   : > { %p1847_p10 = pneg %p2429_p9 }
  0x3f   : > { %s584_s24 = scalar_lea.hbm %s2843_s2, %s2807_s22  ;;  %s1850_s14 = scalar_lea.hbm %s2843_s2, 16 }
  0x40   : > { %s586_s17 = sshll.u32 %s584_s24, 4  ;;  %s587_s17 = int_to_ptr.hbm [resolvable:$true] %s586_s17 }
  0x41   : > { %s1843_s12 = sshra.s32 %s587_s17, 4  ;;  %s1844_s12 = int_to_ptr.hbm [resolvable:$true] %s1843_s12 }
  0x42   : > { %s1845_s15 = scalar_lea.hbm %s1844_s12, 8  ;;  %p1851_p2 = scmp.lt.s32.totalorder %s1844_s12, %s2843_s2 }
  0x43   : > { %p1846_p7 = scmp.ne.s32.totalorder %s1844_s12, %s1845_s15  ;;  %p1852_p4 = scmp.lt.s32.totalorder %s1850_s14, %s1845_s15 }
  0x45   : > { %p1848_p11 = pnand %p1847_p10, %p1846_p7  ;;  %p1853_p5 = por %p1852_p4, %p1851_p2 }
  0x47   : > { %p1849_p12 = pneg %p1848_p11 }
  0x49   : > { %p1854_p1 = pnand %p1853_p5, %p1849_p12 }
  0x4b   : > { %1857 = shalt.err (!%p1854_p1)
}
  0x4c   : > { %1705 = dma.hbm_to_vmem [thread:$0]  (!%p2429_p9), %s587_s17, 128, %s589_s13, %s2442_s16  }
  0x4d   : > { %s2844_s1 = sld [smem:[#allocation39_spill]]  ;;  %s2461_s26 = scalar_lea.vmem [#allocation9], %s1590_s29 }
  0x4e   : > { %s2247_s15 = smov [#allocation2]   ;;  %s2845_s8 = sld [smem:[#allocation46_spill]] }
  0x4f   : > { %s2248_s13 = smov [#allocation12]   ;;  %s2846_s10 = sld [smem:[#allocation47_spill]] }
  0x50   : > { %s523_s17 = sshll.u32 %s2248_s13, 4  ;;  %s2847_s24 = smov 8   ;;  %s524_s17 = int_to_ptr.vmem [resolvable:$true] %s523_s17 }
  0x51   : > { %s2848_s28 = smov 128   ;;  %s2849_s21 = sshll.u32 %s2242_s27, 3 }
  0x52   : > { %s2850_s22 = sld [smem:[#allocation40_spill]]  ;;  %s2851_s12 = sshll.u32 %s2421_s19, 3 }
  0x53   : > { %s489_s11 = sshll.u32 %s2844_s1, 4  ;;  %s561_s2 = scalar_lea.vmem [#allocation6], %s2851_s12  ;;  %s490_s11 = int_to_ptr.hbm [resolvable:$true] %s489_s11 }
  0x54   : > { %1689 = dma.hbm_to_smem (!%p2382_p6), %s490_s11, 16, %s2247_s15, [#allocation5]  }
  0x55   : > { %s521_s14 = sshll.u32 %s2845_s8, 4  ;;  %s538_s29 = sshll.u32 %s2846_s10, 4  ;;  %s522_s14 = int_to_ptr.hbm [resolvable:$true] %s521_s14  ;;  %s539_s29 = int_to_ptr.hbm [resolvable:$true] %s538_s29 }
  0x56   : > { %1695 = dma.hbm_to_vmem [thread:$0]  (!%p2382_p6), %s522_s14, 512, %s524_s17, [#allocation11], %s2848_s28, %s2848_s28, %s2847_s24  }
  0x57   : > { %s2249_s11 = smov [#allocation13]   ;;  %s569_s8 = sshll.u32 %s561_s2, 4  ;;  %s570_s8 = int_to_ptr.vmem [resolvable:$true] %s569_s8 }
  0x58   : > { %s540_s15 = sshll.u32 %s2249_s11, 4  ;;  %s565_s1 = scalar_lea.hbm %s2850_s22, %s2849_s21  ;;  %s541_s15 = int_to_ptr.vmem [resolvable:$true] %s540_s15 }
  0x59   : > { %1698 = dma.hbm_to_vmem [thread:$0]  (!%p2382_p6), %s539_s29, 512, %s541_s15, [#allocation14], %s2848_s28, %s2848_s28, %s2847_s24  }
  0x5a   : > { %s567_s10 = sshll.u32 %s565_s1, 4  ;;  %s1648_s14 = sshll.u32 %s2242_s27, 4  ;;  %s568_s10 = int_to_ptr.hbm [resolvable:$true] %s567_s10 }
  0x5b   : > { %s558_s17 = scalar_lea.sflag [#allocation3], %s2421_s19  ;;  %s1948_s11 = sshra.s32 %s568_s10, 4  ;;  %s1949_s11 = int_to_ptr.hbm [resolvable:$true] %s1948_s11 }
  0x5c   : > { %s1950_s20 = scalar_lea.hbm %s1949_s11, 8  ;;  %s1955_s21 = scalar_lea.hbm %s2850_s22, 16 }
  0x5d   : > { %p1951_p1 = scmp.ne.s32.totalorder %s1949_s11, %s1950_s20  ;;  %p1956_p7 = scmp.lt.s32.totalorder %s1949_s11, %s2850_s22 }
  0x5e   : > { %p1957_p11 = scmp.lt.s32.totalorder %s1955_s21, %s1950_s20 }
  0x5f   : > { %p1953_p5 = pnand %p1951_p1, %p1847_p10 }
  0x60   : > { %p1958_p12 = por %p1957_p11, %p1956_p7 }
  0x61   : > { %p1954_p6 = pneg %p1953_p5 }
  0x63   : > { %p1959_p2 = pnand %p1958_p12, %p1954_p6 }
  0x65   : > { %1962 = shalt.err (!%p1959_p2)
}
  0x66   : > { %1702 = dma.hbm_to_vmem [thread:$0]  (!%p2429_p9), %s568_s10, 128, %s570_s8, %s558_s17  }
  0x67   : > { %s2852_s2 = sshll.u32 %s2461_s26, 4  ;;  %s2853_s3 = sld [smem:[#allocation42_spill]]  ;;  %s608_s2 = int_to_ptr.vmem [resolvable:$true] %s2852_s2 }
  0x6d   : > { %s604_s1 = scalar_lea.hbm %s2853_s3, %s1648_s14  ;;  %s1985_s8 = scalar_lea.hbm %s2853_s3, 32 }
  0x6e   : > { %s605_s29 = sshll.u32 %s604_s1, 4  ;;  %s606_s29 = int_to_ptr.hbm [resolvable:$true] %s605_s29 }
  0x6f   : > { %s1978_s15 = sshra.s32 %s606_s29, 4  ;;  %s1979_s15 = int_to_ptr.hbm [resolvable:$true] %s1978_s15 }
  0x70   : > { %s1980_s11 = scalar_lea.hbm %s1979_s15, 16  ;;  %p1986_p6 = scmp.lt.s32.totalorder %s1979_s15, %s2853_s3 }
  0x71   : > { %p1981_p4 = scmp.ne.s32.totalorder %s1979_s15, %s1980_s11  ;;  %p1987_p7 = scmp.lt.s32.totalorder %s1985_s8, %s1980_s11 }
  0x73   : > { %p1983_p1 = pnand %p1981_p4, %p1847_p10  ;;  %p1988_p11 = por %p1987_p7, %p1986_p6 }
  0x75   : > { %p1984_p5 = pneg %p1983_p1 }
  0x77   : > { %p1989_p12 = pnand %p1988_p11, %p1984_p5 }
  0x79   : > { %1992 = shalt.err (!%p1989_p12)
}
  0x7a   : > { %1708 = dma.hbm_to_vmem [thread:$0]  (!%p2429_p9), %s606_s29, 256, %s608_s2, %s2442_s16, %s2848_s28, %s2848_s28, %s2847_s24  }
  0x7b   : > { %619 = sbr.rel (%p2373_p3) target bundleno = 1151 (0x47f), region = 68  ;;  %p2854_p10 = scmp.eq.s32.totalorder (!%p2373_p3), %s2368_s30, 0 }
  0x80   : > { %2193 = dma.done.wait (%p2854_p10), [#allocation5], 16   ;;  %p2855_p2 = pmov %p2854_p10 }
  0x81   : > { %s2529_s14 = sand.u32 1, %s2234_s25  }
  0x82   : > { %2195 = vsyncadd (%p2855_p2), [#allocation5], 4294967280  ;;  %s2532_s4 = sshll.u32 %s2529_s14, 3  ;;  %s627_s17 = scalar_lea.sflag [#allocation3], %s2529_s14 }
  0x83   : > { %s630_s16 = scalar_lea.vmem [#allocation6], %s2532_s4 }
  0x84   : > { %2197 = dma.done.wait (%p2409_p13), %s627_s17, 128  }
  0x85   : > { %2199 = vsyncadd (%p2409_p13), %s627_s17, 4294967168  ;;  %s2541_s18 = sand.u32 1, %s2368_s30   ;;  %s640_s28 = scalar_lea.vmem [#allocation7], %s2532_s4 }
  0x86   : > { %s637_s24 = scalar_lea.sflag [#allocation8], %s2541_s18 }
  0x87   : > { %2201 = dma.done.wait (%p2409_p13), %s637_s24, 384  }
  0x88   : > { %2203 = vsyncadd (%p2409_p13), %s637_s24, 4294966912  ;;  %s2550_s23 = sshll.u32 %s2529_s14, 4  ;;  %p2856_p3 = pmov %p2855_p2 }
  0x89   : > { %s650_s12 = scalar_lea.vmem [#allocation9], %s2550_s23 }
  0x8a   : > { %2205 = dma.done.wait (%p2856_p3), [#allocation11], 1024   ;;  %p2857_p9 = pmov %p2855_p2 }
  0x8b   : > { %p2858_p4 = pmov %p2855_p2 }
  0x8c   : > { %2207 = vsyncadd (%p2857_p9), [#allocation11], 4294966272 }
  0x8d   : > { %2209 = dma.done.wait (%p2858_p4), [#allocation14], 512   ;;  %p2859_p1 = pmov %p2855_p2 }
  0x8f   : > { %2211 = vsyncadd (%p2859_p1), [#allocation14], 4294966784 }
  0x90   : > { %671 = sfence }
  0x91   : > { %v764_v0 = vld [vmem:[#allocation10 + $0x18] sm:$0xff]  ;;  %v763_v1 = vld [vmem:[#allocation10 + $0x10] sm:$0xff]  ;;  %v762_v2 = vld [vmem:[#allocation10 + $0x8] sm:$0xff]  ;;  %vm765_vm0 = vcmask 261120   ;;  %v790_v5 = vlaneseq  ;;  %s2860_s5 = sld [smem:[#allocation44_spill]]  ;;  %v2250_v8 = vmov 0.0  }
  0x92   : > { %781 = vmatpush.msra.mxu0 %v764_v0  ;;  %v761_v3 = vld [vmem:[#allocation10] sm:$0xff]  ;;  %s2861_s6 = sld [smem:[#allocation45_spill]]  ;;  %v754_v32 = vld [vmem:[%s640_s28] sm:$0xff]  ;;  %vm839_vm7 = vcmask 64512   ;;  %v1005_v43 = vld [vmem:[#allocation12 + $0x8] sm:$0xff]  ;;  %s2587_s20 = scalar_lea.vmem [#allocation19], %s2550_s23 }
  0x93   : > { %v2561_v4 = vld [vmem:[%s630_s16] sm:$0xff]  ;;  %v791_v6 = vand.u32 127, %v790_v5  ;;  %vm837_vm6 = vcmp.gt.f32.partialorder %v754_v32, 0.0  ;;  %v1007_v41 = vld [vmem:[#allocation12 + $0x18] sm:$0xff]  ;;  %v1006_v42 = vld [vmem:[#allocation12 + $0x10] sm:$0xff]  ;;  %s1608_s1 = sld [smem:[#allocation2 + $0x2]] }
  0x94   : > { %782 = vmatpush.msra.mxu0 %v763_v1  ;;  %v1004_v44 = vld [vmem:[#allocation12] sm:$0xff]  ;;  %s757_s29 = sld [smem:[#allocation2]]  ;;  %s2592_s21 = scalar_lea.vmem [#allocation21], %s2550_s23  ;;  %v1056_v32 = vld [vmem:[#allocation13 + $0x8] sm:$0xff] }
  0x95   : > { %vm872_vm1 = vcmp.ge.s32.totalorder %v791_v6, 16  ;;  %vm873_vm2 = vcmp.lt.s32.totalorder %v791_v6, 32  ;;  %vm793_vm4 = vcmp.lt.s32.totalorder %v791_v6, 16  ;;  %s1609_s15 = sld [smem:[#allocation2 + $0x3]]  ;;  %s2606_s8 = scalar_lea.vmem [#allocation22], %s2550_s23 }
  0x96   : > { %783 = vmatpush.msra.mxu0 %v762_v2  ;;  %vm874_vm3 = vmand %vm872_vm1, %vm873_vm2  ;;  %v1611_v12 = vsel %vm793_vm4, 1.0, %v2250_v8  ;;  %s1607_s11 = sld [smem:[#allocation2 + $0x1]]  ;;  %s2810_s0 = scalar_lea.vmem [#allocation15], %s2532_s4 }
  0x97   : > { %v755_v7 = vld [vmem:[%s2860_s5] sm:$0x1]  ;;  %v1614_v9 = vsel %vm874_vm3, 1.0, %v2250_v8  ;;  %s2862_s23 = sld [smem:[#allocation48_spill]]  ;;  %s2628_s19 = sshll.u32 %s2368_s30, 4 }
  0x98   : > { %784 = vmatpush.msra.mxu0 %v761_v3  ;;  %v877_v11 = vmul.f32 %v1614_v9, %v755_v7  ;;  %v756_v13 = vld [vmem:[%s2861_s6] sm:$0x1]  ;;  %v797_v15 = vmul.f32 %v1611_v12, %v755_v7  ;;  %s2631_s13 = sshll.u32 %s2368_s30, 3  ;;  %s1226_s10 = sshll.u32 %s2587_s20, 4  ;;  %s1227_s10 = int_to_ptr.vmem [resolvable:$true] %s1226_s10 }
  0x99   : > { %1610 = vmatmul.msk.f32.vlgmr.msra.gmra.mxu0 %vm765_vm0, %v2561_v4  ;;  %v885_v17 = vmul.f32 %v1614_v9, %v756_v13  ;;  %v805_v18 = vmul.f32 %v1611_v12, %v756_v13  ;;  %v857_v57 = vstv %s1608_s1  ;;  %v1623_v13 = vld [vmem:[%s650_s12 + $0x8] sm:$0xff]  ;;  %s2811_s17 = scalar_lea.sflag [#allocation20], %s2541_s18 }
  0x9a   : > { %v879_v14 = vperm.slane %v877_v11, 0  ;;  %v799_v20 = vperm.slane %v797_v15, 0  ;;  %v853_v58 = vstv %s757_s29 }
  0x9b   : > { %v859_v61 = vstv %s1609_s15  ;;  %s2864_s15 = sld [smem:[#allocation52_spill]] }
  0x9c   : > { %v855_v62 = vstv %s1607_s11 }
  0xa1   : > { %s1225_s11 = scalar_lea.hbm %s2864_s15, %s2628_s19  ;;  %s2028_s30 = scalar_lea.hbm %s2864_s15, 32 }
  0xa2   : > { %s1228_s26 = sshll.u32 %s1225_s11, 4  ;;  %s1229_s26 = int_to_ptr.hbm [resolvable:$true] %s1228_s26 }
  0xa3   : > { %s2022_s16 = sshra.s32 %s1229_s26, 4  ;;  %s2023_s16 = int_to_ptr.hbm [resolvable:$true] %s2022_s16 }
  0xa4   : > { %s2024_s24 = scalar_lea.hbm %s2023_s16, 16  ;;  %p2029_p7 = scmp.lt.s32.totalorder %s2023_s16, %s2864_s15 }
  0xa5   : > { %p2025_p13 = scmp.ne.s32.totalorder %s2023_s16, %s2024_s24  ;;  %p2030_p11 = scmp.lt.s32.totalorder %s2028_s30, %s2024_s24 }
  0xa7   : > { %p2026_p5 = pnand %p2025_p13, %p2413_p0  ;;  %p2031_p12 = por %p2030_p11, %p2029_p7 }
  0xa9   : > { %p2027_p6 = pneg %p2026_p5 }
  0xab   : > { %p2032_p10 = pnand %p2031_p12, %p2027_p6 }
 0x116   : > { %v786_v10 = vpop.f32.mrf.mxu0 }
 0x117   : > { %1783 = vtanh.f32 %v786_v10  ;;  %1617 = vmatpush.msk.msra.mxu3 %vm874_vm3, %v786_v10 }
 0x119   : > { %1619 = vmatpush.msk.msrb.mxu3 %vm793_vm4, %v786_v10 }
 0x11d   : > { %v1784_v16 = vpop.eup %1783 }
 0x11e   : > { %1612 = vmatpush.xpose.msk.msra.mxu1 %vm765_vm0, %v1784_v16  ;;  %1615 = vmatpush.xpose.msk.msra.mxu2 %vm765_vm0, %v1784_v16  ;;  %v881_v19 = vmul.f32 %v1784_v16, %v879_v14  ;;  %v801_v22 = vmul.f32 %v1784_v16, %v799_v20 }
 0x120   : > { %v882_v21 = vsel %vm765_vm0, %v881_v19, 0.0  ;;  %v802_v23 = vsel %vm765_vm0, %v801_v22, 0.0  ;;  %v863_v19 = vld [vmem:[%s650_s12] sm:$0xff]  ;;  %s2251_s12 = smov 96  }
 0x121   : > { %1616 = vmatmul.msk.f32.vlgmr.msra.gmra.mxu2 %vm765_vm0, %v885_v17  ;;  %883 = vadd.xlane.f32.xlu0 %v882_v21 }
 0x122   : > { %1613 = vmatmul.msk.f32.vlgmr.msra.gmra.mxu1 %vm765_vm0, %v805_v18 }
 0x123   : > { %1024 = vmatpush.msrb.mxu1 %v1007_v41 }
 0x125   : > { %1025 = vmatpush.msrb.mxu1 %v1006_v42 }
 0x127   : > { %1026 = vmatpush.msrb.mxu1 %v1005_v43 }
 0x129   : > { %803 = vadd.xlane.f32.xlu0 %v802_v23  ;;  %1027 = vmatpush.msrb.mxu1 %v1004_v44 }
 0x12a   : > { %1626 = vmatmul.msk.f32.vlgmr.msrb.gmra.mxu1 %vm765_vm0, %v2561_v4 }
 0x194   : > { %v884_v24 = vpop.xlane.xlu0 %883 }
 0x19c   : > { %v804_v29 = vpop.xlane.xlu0 %803 }
 0x19f   : > { %v829_v25 = vpop.f32.mrf.mxu1 }
 0x1a0   : > { %v832_v26 = vperm.slane %v829_v25, 0 }
 0x1a2   : > { %v833_v30 = vadd.f32 %v832_v26, %v804_v29 }
 0x1a4   : > { %v906_v27 = vpop.f32.mrf.mxu2  ;;  %v835_v35 = vmul.f32 0.2, %v833_v30  ;;  %vm834_vm8 = vcmp.gt.f32.partialorder %v833_v30, 0.0 }
 0x1a5   : > { %v909_v28 = vperm.slane %v906_v27, 0 }
 0x1a6   : > { %v836_v38 = vsel %vm834_vm8, %v833_v30, %v835_v35  ;;  %v1058_v30 = vld [vmem:[#allocation13 + $0x18] sm:$0xff] }
 0x1a7   : > { %v910_v31 = vadd.f32 %v909_v28, %v884_v24  ;;  %v838_v39 = vsel %vm837_vm6, %v836_v38, -1e+09  ;;  %v1780_v24 = vld [vmem:[%s2779_s9] ss:$0 sm:$0xff]  ;;  %v1029_v25 = vpop.f32.mrf.mxu1  ;;  %1078 = vmatpush.msrb.mxu2 %v1058_v30 }
 0x1a8   : > { %v840_v40 = vsel %vm839_vm7, %v838_v39, -inf  ;;  %v1030_v26 = vadd.f32 %v1780_v24, %v1029_v25  ;;  %v1781_v38 = vld [vmem:[%s2777_s7] ss:$0 sm:$0xff] }
 0x1a9   : > { %vm911_vm5 = vcmp.gt.f32.partialorder %v910_v31, 0.0  ;;  %v912_v33 = vmul.f32 0.2, %v910_v31 }
 0x1aa   : > { %v1627_v27 = vmul.f32 -1.442695, %v1030_v26 }
 0x1ab   : > { %v913_v34 = vsel %vm911_vm5, %v910_v31, %v912_v33  ;;  %v1057_v31 = vld [vmem:[#allocation13 + $0x10] sm:$0xff]  ;;  %v1055_v33 = vld [vmem:[#allocation13] sm:$0xff] }
 0x1ac   : > { %v914_v36 = vsel %vm837_vm6, %v913_v34, -1e+09  ;;  %1079 = vmatpush.msrb.mxu2 %v1057_v31 }
 0x1ad   : > { %v915_v37 = vsel %vm839_vm7, %v914_v36, -inf }
 0x1ae   : > { %916 = vmax.xlane.f32.xlu1 %v915_v37  ;;  %1080 = vmatpush.msrb.mxu2 %v1056_v32 }
 0x1b0   : > { %1081 = vmatpush.msrb.mxu2 %v1055_v33 }
 0x1b6   : > { %841 = vmax.xlane.f32.xlu1 %v840_v40 }
 0x221   : > { %v917_v45 = vpop.xlane.xlu1 %916 }
 0x222   : > { %v918_v46 = vsub.f32 %v914_v36, %v917_v45 }
 0x224   : > { %v919_v47 = vmul.f32 1.442695, %v918_v46 }
 0x226   : > { %1785 = vpow2.f32 %v919_v47 }
 0x229   : > { %v842_v48 = vpop.xlane.xlu1 %841 }
 0x22a   : > { %v843_v49 = vsub.f32 %v838_v39, %v842_v48 }
 0x22c   : > { %v1786_v50 = vpop.eup %1785  ;;  %v844_v51 = vmul.f32 1.442695, %v843_v49 }
 0x22d   : > { %v921_v52 = vsel %vm839_vm7, %v1786_v50, 0.0 }
 0x22e   : > { %1787 = vpow2.f32 %v844_v51  ;;  %922 = vadd.xlane.f32.xlu2 %v921_v52 }
 0x234   : > { %v1788_v53 = vpop.eup %1787 }
 0x235   : > { %v846_v54 = vsel %vm839_vm7, %v1788_v53, 0.0 }
 0x236   : > { %847 = vadd.xlane.f32.xlu2 %v846_v54 }
 0x2a1   : > { %v923_v55 = vpop.xlane.xlu2 %922 }
 0x2a2   : > { %1789 = vrcp.f32 %v923_v55 }
 0x2a8   : > { %v1790_v56 = vpop.eup %1789 }
 0x2a9   : > { %v925_v59 = vmul.f32 %v1790_v56, %v1786_v50  ;;  %v848_v60 = vpop.xlane.xlu2 %847 }
 0x2aa   : > { %1791 = vrcp.f32 %v848_v60 }
 0x2ab   : > { %v976_v63 = vmul.f32 %v925_v59, %v857_v57  ;;  %1618 = vmatmul.msk.f32.vlgmr.msra.gmra.mxu3 %vm839_vm7, %v925_v59  ;;  %v974_v0 = vmul.f32 %v925_v59, %v853_v58  ;;  %vm989_vm9 = vcmp.eq.f32.partialorder %v925_v59, 0.0 }
 0x2ad   : > { %v977_v1 = vadd.f32 %v976_v63, %v859_v61  ;;  %v975_v2 = vadd.f32 %v974_v0, %v855_v62 }
 0x2af   : > { %v984_v3 = vmul.f32 0.5, %v977_v1  ;;  %1621 = vst.msk [vmem:[%s2587_s20 + $0x8] sm:$0xff] %vm839_vm7, %v975_v2 }
 0x2b0   : > { %v1792_v5 = vpop.eup %1791  ;;  %1622 = vst.msk [vmem:[%s2592_s21 + $0x8] sm:$0xff] %vm839_vm7, %v977_v1 }
 0x2b1   : > { %v985_v6 = vmul.f32 1.442695, %v984_v3  ;;  %v850_v7 = vmul.f32 %v1792_v5, %v1788_v53 }
 0x2b3   : > { %1793 = vpow2.f32 %v985_v6  ;;  %v858_v8 = vmul.f32 %v857_v57, %v850_v7  ;;  %1620 = vmatmul.msk.f32.vlgmr.msrb.gmra.mxu3 %vm839_vm7, %v850_v7  ;;  %v854_v9 = vmul.f32 %v853_v58, %v850_v7  ;;  %vm869_vm10 = vcmp.eq.f32.partialorder %v850_v7, 0.0  ;;  %v1782_v58 = vld [vmem:[%s2862_s23] ss:$0 sm:$0xff] }
 0x2b5   : > { %v860_v10 = vadd.f32 %v859_v61, %v858_v8  ;;  %v856_v11 = vadd.f32 %v855_v62, %v854_v9 }
 0x2b7   : > { %v864_v12 = vmul.f32 0.5, %v860_v10  ;;  %861 = vst.msk [vmem:[%s2587_s20] sm:$0xff] %vm839_vm7, %v856_v11 }
 0x2b8   : > { %862 = vst.msk [vmem:[%s2592_s21] sm:$0xff] %vm839_vm7, %v860_v10 }
 0x2b9   : > { %v1794_v14 = vpop.eup %1793  ;;  %v865_v15 = vmul.f32 1.442695, %v864_v12 }
 0x2ba   : > { %v987_v16 = vmul.f32 %v1794_v14, %v1623_v13 }
 0x2bb   : > { %1795 = vpow2.f32 %v865_v15 }
 0x2bc   : > { %v988_v17 = vadd.f32 %v987_v16, %v975_v2  ;;  %1797 = vpow2.f32 %v1627_v27 }
 0x2be   : > { %v990_v18 = vsel %vm989_vm9, %v925_v59, %v988_v17 }
 0x2bf   : > { %1624 = vst.msk [vmem:[%s2606_s8 + $0x8] sm:$0xff] %vm839_vm7, %v990_v18 }
 0x2c1   : > { %v1796_v20 = vpop.eup %1795 }
 0x2c2   : > { %v867_v21 = vmul.f32 %v1796_v20, %v863_v19  ;;  %v1798_v28 = vpop.eup %1797 }
 0x2c3   : > { %v1035_v29 = vadd.f32 1.0, %v1798_v28 }
 0x2c4   : > { %v868_v22 = vadd.f32 %v867_v21, %v856_v11 }
 0x2c5   : > { %1799 = vrcp.f32 %v1035_v29  ;;  %vm1041_vm11 = vweird.f32 %v1035_v29  ;;  %v1047_v43 = vand.u32 2147483648, %v1035_v29  ;;  %v1045_v46 = vand.u32 2147483647, %v1035_v29 }
 0x2c6   : > { %v870_v23 = vsel %vm869_vm10, %v850_v7, %v868_v22 }
 0x2c7   : > { %871 = vst.msk [vmem:[%s2606_s8] sm:$0xff] %vm839_vm7, %v870_v23  ;;  %v1048_v48 = vor.u32 1.1754944e-38, %v1047_v43  ;;  %vm1046_vm14 = vcmp.eq.f32.partialorder %v1045_v46, 8.507059e+37 }
 0x2cb   : > { %v1800_v34 = vpop.eup %1799 }
 0x2cc   : > { %v1037_v36 = vmul.f32 %v1800_v34, %v1035_v29  ;;  %vm1042_vm12 = vweird.f32 %v1800_v34 }
 0x2cd   : > { %vm1043_vm13 = vmor %vm1041_vm11, %vm1042_vm12 }
 0x2ce   : > { %v1038_v37 = vsub.f32 1.0, %v1037_v36 }
 0x2d0   : > { %v1039_v41 = vmul.f32 %v1800_v34, %v1038_v37 }
 0x2d2   : > { %v1040_v45 = vadd.f32 %v1800_v34, %v1039_v41 }
 0x2d4   : > { %v1044_v49 = vsel %vm1043_vm13, %v1800_v34, %v1040_v45 }
 0x2d5   : > { %v1049_v50 = vsel %vm1046_vm14, %v1048_v48, %v1044_v49 }
 0x2d6   : > { %v1052_v52 = vsub.f32 1.0, %v1049_v50 }
 0x2d8   : > { %v1053_v56 = vmul.f32 %v1052_v52, %v2561_v4 }
 0x32e   : > { %v948_v35 = vpop.f32.mrf.mxu3 }
 0x336   : > { %v971_v39 = vpop.f32.mrf.mxu3 }
 0x337   : > { %v972_v40 = vadd.f32 %v971_v39, %v948_v35 }
 0x339   : > { %v997_v42 = vadd.f32 %v1781_v38, %v972_v40 }
 0x33b   : > { %v999_v44 = vmin.f32 %v997_v42, 0.0  ;;  %vm998_vm15 = vcmp.gt.f32.partialorder %v997_v42, 0.0 }
 0x33d   : > { %v1000_v47 = vmul.f32 1.442695, %v999_v44 }
 0x33f   : > { %1801 = vpow2.f32 %v1000_v47 }
 0x345   : > { %v1802_v51 = vpop.eup %1801 }
 0x346   : > { %v1625_v53 = vadd.f32 -1.0, %v1802_v51 }
 0x348   : > { %v1003_v54 = vsel %vm998_vm15, %v997_v42, %v1625_v53 }
 0x349   : > { %v1051_v55 = vmul.f32 %v1049_v50, %v1003_v54 }
 0x34b   : > { %v1054_v57 = vadd.f32 %v1053_v56, %v1051_v55 }
 0x34d   : > { %1628 = vmatmul.msk.f32.vlgmr.msrb.gmra.mxu2 %vm765_vm0, %v1054_v57 }
 0x3d0   : > { %v1083_v59 = vpop.f32.mrf.mxu2 }
 0x3d1   : > { %v1084_v60 = vadd.f32 %v1782_v58, %v1083_v59 }
 0x3d3   : > { %v1630_v61 = vmul.f32 -1.442695, %v1084_v60  ;;  %1088 = vrot.lane.b32.xlu1 %v1084_v60, %s2251_s12  ;;  %1086 = vst.msk [vmem:[%s2810_s0] sm:$0xff] %vm765_vm0, %v1084_v60 }
 0x3d5   : > { %1803 = vpow2.f32 %v1630_v61 }
 0x3db   : > { %v1804_v62 = vpop.eup %1803 }
 0x3dc   : > { %v1114_v63 = vadd.f32 1.0, %v1804_v62 }
 0x3de   : > { %1805 = vrcp.f32 %v1114_v63  ;;  %v1126_v3 = vand.u32 2147483648, %v1114_v63  ;;  %v1124_v6 = vand.u32 2147483647, %v1114_v63  ;;  %vm1120_vm2 = vweird.f32 %v1114_v63 }
 0x3e0   : > { %v1127_v8 = vor.u32 1.1754944e-38, %v1126_v3  ;;  %vm1125_vm4 = vcmp.eq.f32.partialorder %v1124_v6, 8.507059e+37 }
 0x3e4   : > { %v1806_v0 = vpop.eup %1805 }
 0x3e5   : > { %v1116_v1 = vmul.f32 %v1806_v0, %v1114_v63  ;;  %vm1121_vm1 = vweird.f32 %v1806_v0 }
 0x3e6   : > { %vm1122_vm3 = vmor %vm1120_vm2, %vm1121_vm1 }
 0x3e7   : > { %v1117_v2 = vsub.f32 1.0, %v1116_v1 }
 0x3e9   : > { %v1118_v5 = vmul.f32 %v1806_v0, %v1117_v2 }
 0x3eb   : > { %v1119_v7 = vadd.f32 %v1806_v0, %v1118_v5 }
 0x3ed   : > { %v1123_v9 = vsel %vm1122_vm3, %v1806_v0, %v1119_v7 }
 0x3ee   : > { %v1128_v10 = vsel %vm1125_vm4, %v1127_v8, %v1123_v9 }
 0x3ef   : > { %1131 = vrot.lane.b32.xlu0 %v1128_v10, %s2251_s12 }
 0x3f0   : > { %2035 = shalt.err (!%p2032_p10)
}
 0x3f1   : > { %s2812_s20 = smov 128   ;;  %s2253_s1 = smov 8  }
 0x3f2   : > { %1677 = dma.vmem_to_hbm [thread:$0]  (%p2413_p0), %s1227_s10, 256, %s1229_s26, %s2811_s17, %s2812_s20, %s2812_s20, %s2253_s1  }
 0x3f3   : > { %s2865_s11 = sld [smem:[#allocation49_spill]]  ;;  %s2866_s24 = scalar_lea.vmem [#allocation15], %s2532_s4 }
 0x3f4   : > { %s1184_s28 = sshll.u32 %s2866_s24, 4  ;;  %s1147_s30 = scalar_lea.sflag [#allocation4], %s2529_s14  ;;  %s1185_s28 = int_to_ptr.vmem [resolvable:$true] %s1184_s28 }
 0x3f9   : > { %s1182_s16 = scalar_lea.hbm %s2865_s11, %s2631_s13  ;;  %s2056_s10 = scalar_lea.hbm %s2865_s11, 16 }
 0x3fa   : > { %s1186_s23 = sshll.u32 %s1182_s16, 4  ;;  %s1187_s23 = int_to_ptr.hbm [resolvable:$true] %s1186_s23 }
 0x3fb   : > { %s2050_s12 = sshra.s32 %s1187_s23, 4  ;;  %s2051_s12 = int_to_ptr.hbm [resolvable:$true] %s2050_s12 }
 0x3fc   : > { %s2052_s3 = scalar_lea.hbm %s2051_s12, 8  ;;  %p2057_p4 = scmp.lt.s32.totalorder %s2051_s12, %s2865_s11 }
 0x3fd   : > { %p2053_p2 = scmp.ne.s32.totalorder %s2051_s12, %s2052_s3  ;;  %p2058_p1 = scmp.lt.s32.totalorder %s2056_s10, %s2052_s3 }
 0x3ff   : > { %p2054_p3 = pnand %p2053_p2, %p2413_p0  ;;  %p2059_p13 = por %p2058_p1, %p2057_p4 }
 0x401   : > { %p2055_p9 = pneg %p2054_p3 }
 0x403   : > { %p2060_p5 = pnand %p2059_p13, %p2055_p9 }
 0x405   : > { %2063 = shalt.err (!%p2060_p5)
}
 0x406   : > { %1674 = dma.vmem_to_hbm [thread:$0]  (%p2413_p0), %s1185_s28, 128, %s1187_s23, %s1147_s30  }
 0x407   : > { %s2867_s24 = sld [smem:[#allocation53_spill]]  ;;  %s1243_s5 = sshll.u32 %s2592_s21, 4  ;;  %s1244_s5 = int_to_ptr.vmem [resolvable:$true] %s1243_s5 }
 0x40d   : > { %s2868_s17 = smov %s2867_s24  ;;  %s1242_s20 = scalar_lea.hbm %s2867_s24, %s2628_s19 }
 0x40e   : > { %s1245_s6 = sshll.u32 %s1242_s20, 4  ;;  %s2084_s0 = scalar_lea.hbm %s2868_s17, 32  ;;  %s1246_s6 = int_to_ptr.hbm [resolvable:$true] %s1245_s6 }
 0x40f   : > { %s2078_s26 = sshra.s32 %s1246_s6, 4  ;;  %s2079_s26 = int_to_ptr.hbm [resolvable:$true] %s2078_s26 }
 0x410   : > { %s2080_s3 = scalar_lea.hbm %s2079_s26, 16  ;;  %p2085_p12 = scmp.lt.s32.totalorder %s2079_s26, %s2868_s17 }
 0x411   : > { %p2081_p6 = scmp.ne.s32.totalorder %s2079_s26, %s2080_s3  ;;  %p2086_p10 = scmp.lt.s32.totalorder %s2084_s0, %s2080_s3 }
 0x413   : > { %p2082_p7 = pnand %p2081_p6, %p2413_p0  ;;  %p2087_p2 = por %p2086_p10, %p2085_p12 }
 0x415   : > { %p2083_p11 = pneg %p2082_p7 }
 0x417   : > { %p2088_p3 = pnand %p2087_p2, %p2083_p11 }
 0x419   : > { %2091 = shalt.err (!%p2088_p3)
}
 0x41a   : > { %s2869_s21 = smov 128   ;;  %s2870_s20 = scalar_lea.sflag [#allocation20], %s2541_s18 }
 0x41b   : > { %1678 = dma.vmem_to_hbm [thread:$0]  (%p2413_p0), %s1244_s5, 256, %s1246_s6, %s2870_s20, %s2869_s21, %s2869_s21, %s2253_s1  }
 0x41c   : > { %s2871_s16 = sld [smem:[#allocation54_spill]]  ;;  %s1260_s26 = sshll.u32 %s2606_s8, 4  ;;  %s1261_s26 = int_to_ptr.vmem [resolvable:$true] %s1260_s26 }
 0x41d   : > { %s1172_s12 = scalar_lea.sflag [#allocation23], %s2529_s14 }
 0x422   : > { %s1259_s24 = scalar_lea.hbm %s2871_s16, %s2628_s19  ;;  %s2112_s5 = scalar_lea.hbm %s2871_s16, 32 }
 0x423   : > { %s1262_s3 = sshll.u32 %s1259_s24, 4  ;;  %s1263_s3 = int_to_ptr.hbm [resolvable:$true] %s1262_s3 }
 0x424   : > { %s2106_s10 = sshra.s32 %s1263_s3, 4  ;;  %s2107_s10 = int_to_ptr.hbm [resolvable:$true] %s2106_s10 }
 0x425   : > { %s2108_s0 = scalar_lea.hbm %s2107_s10, 16  ;;  %p2113_p13 = scmp.lt.s32.totalorder %s2107_s10, %s2871_s16 }
 0x426   : > { %p2109_p9 = scmp.ne.s32.totalorder %s2107_s10, %s2108_s0  ;;  %p2114_p5 = scmp.lt.s32.totalorder %s2112_s5, %s2108_s0 }
 0x428   : > { %p2110_p4 = pnand %p2109_p9, %p2413_p0  ;;  %p2115_p6 = por %p2114_p5, %p2113_p13 }
 0x42a   : > { %p2111_p1 = pneg %p2110_p4 }
 0x42c   : > { %p2116_p7 = pnand %p2115_p6, %p2111_p1 }
 0x42e   : > { %2119 = shalt.err (!%p2116_p7)
}
 0x42f   : > { %1679 = dma.vmem_to_hbm [thread:$0]  (%p2413_p0), %s1261_s26, 256, %s1263_s3, %s1172_s12, %s2869_s21, %s2869_s21, %s2253_s1   ;;  %v1629_v11 = vmul.f32 -1.442695, %v2561_v4 }
 0x430   : > { %s2872_s19 = sld [smem:[#allocation50_spill]]  ;;  %s724_s29 = scalar_lea.vmem [#allocation16], %s2532_s4 }
 0x431   : > { %1807 = vpow2.f32 %v1629_v11  ;;  %s1198_s24 = sshll.u32 %s724_s29, 4  ;;  %s1152_s1 = scalar_lea.sflag [#allocation17], %s2541_s18  ;;  %s1199_s24 = int_to_ptr.vmem [resolvable:$true] %s1198_s24 }
 0x436   : > { %s1196_s30 = scalar_lea.hbm %s2872_s19, %s2631_s13  ;;  %s2140_s0 = scalar_lea.hbm %s2872_s19, 16 }
 0x437   : > { %v1808_v12 = vpop.eup %1807  ;;  %s1200_s10 = sshll.u32 %s1196_s30, 4  ;;  %s1201_s10 = int_to_ptr.hbm [resolvable:$true] %s1200_s10 }
 0x438   : > { %v1095_v13 = vadd.f32 1.0, %v1808_v12  ;;  %s2134_s21 = sshra.s32 %s1201_s10, 4  ;;  %s2135_s21 = int_to_ptr.hbm [resolvable:$true] %s2134_s21 }
 0x439   : > { %s2136_s26 = scalar_lea.hbm %s2135_s21, 8  ;;  %p2141_p2 = scmp.lt.s32.totalorder %s2135_s21, %s2872_s19 }
 0x43a   : > { %1809 = vrcp.f32 %v1095_v13  ;;  %p2137_p11 = scmp.ne.s32.totalorder %s2135_s21, %s2136_s26  ;;  %p2142_p3 = scmp.lt.s32.totalorder %s2140_s0, %s2136_s26 }
 0x43c   : > { %p2138_p12 = pnand %p2137_p11, %p2413_p0  ;;  %p2143_p9 = por %p2142_p3, %p2141_p2 }
 0x43e   : > { %p2139_p10 = pneg %p2138_p12 }
 0x440   : > { %p2144_p4 = pnand %p2143_p9, %p2139_p10 }
 0x445   : > { %v1089_v14 = vpop.permute.xlu1 %1088 }
 0x446   : > { %1091 = vst.msk [vmem:[%s724_s29] sm:$0xff] %vm765_vm0, %v1089_v14 }
 0x447   : > { %2147 = shalt.err (!%p2144_p4)
}
 0x448   : > { %1675 = dma.vmem_to_hbm [thread:$0]  (%p2413_p0), %s1199_s24, 128, %s1201_s10, %s1152_s1   ;;  %v1810_v15 = vpop.eup %1809  ;;  %vm1101_vm5 = vweird.f32 %v1095_v13  ;;  %v1107_v19 = vand.u32 2147483648, %v1095_v13  ;;  %v1105_v21 = vand.u32 2147483647, %v1095_v13 }
 0x449   : > { %v1097_v16 = vmul.f32 %v1810_v15, %v1095_v13  ;;  %vm1102_vm6 = vweird.f32 %v1810_v15  ;;  %s2873_s20 = sld [smem:[#allocation51_spill]]  ;;  %s731_s8 = scalar_lea.vmem [#allocation18], %s2532_s4 }
 0x44a   : > { %vm1103_vm7 = vmor %vm1101_vm5, %vm1102_vm6  ;;  %v1108_v22 = vor.u32 1.1754944e-38, %v1107_v19  ;;  %vm1106_vm8 = vcmp.eq.f32.partialorder %v1105_v21, 8.507059e+37  ;;  %s1212_s30 = sshll.u32 %s731_s8, 4  ;;  %s1213_s30 = int_to_ptr.vmem [resolvable:$true] %s1212_s30 }
 0x44b   : > { %v1098_v17 = vsub.f32 1.0, %v1097_v16 }
 0x44d   : > { %v1099_v18 = vmul.f32 %v1810_v15, %v1098_v17 }
 0x44f   : > { %v1100_v20 = vadd.f32 %v1810_v15, %v1099_v18  ;;  %s1210_s14 = scalar_lea.hbm %s2873_s20, %s2631_s13  ;;  %s2168_s4 = scalar_lea.hbm %s2873_s20, 16 }
 0x450   : > { %s1214_s29 = sshll.u32 %s1210_s14, 4  ;;  %s1215_s29 = int_to_ptr.hbm [resolvable:$true] %s1214_s29 }
 0x451   : > { %v1104_v23 = vsel %vm1103_vm7, %v1810_v15, %v1100_v20  ;;  %s2162_s24 = sshra.s32 %s1215_s29, 4  ;;  %s2163_s24 = int_to_ptr.hbm [resolvable:$true] %s2162_s24 }
 0x452   : > { %v1109_v24 = vsel %vm1106_vm8, %v1108_v22, %v1104_v23  ;;  %s2164_s10 = scalar_lea.hbm %s2163_s24, 8  ;;  %p2169_p6 = scmp.lt.s32.totalorder %s2163_s24, %s2873_s20 }
 0x453   : > { %p2165_p1 = scmp.ne.s32.totalorder %s2163_s24, %s2164_s10  ;;  %p2170_p7 = scmp.lt.s32.totalorder %s2168_s4, %s2164_s10 }
 0x455   : > { %p2166_p13 = pnand %p2165_p1, %p2413_p0  ;;  %p2171_p11 = por %p2170_p7, %p2169_p6 }
 0x457   : > { %p2167_p5 = pneg %p2166_p13 }
 0x459   : > { %p2172_p12 = pnand %p2171_p11, %p2167_p5 }
 0x461   : > { %v1132_v25 = vpop.permute.xlu0 %1131 }
 0x462   : > { %v1134_v26 = vmul.f32 %v1132_v25, %v1109_v24 }
 0x464   : > { %v1135_v27 = vsel %vm765_vm0, %v1134_v26, 0.0 }
 0x465   : > { %v1136_v28 = vrot.slane %v1135_v27, 4 }
 0x467   : > { %v1137_v29 = vadd.f32 %v1136_v28, %v1135_v27 }
 0x469   : > { %v1138_v30 = vrot.slane %v1137_v29, 2 }
 0x46b   : > { %v1139_v31 = vadd.f32 %v1138_v30, %v1137_v29 }
 0x46d   : > { %v1140_v32 = vrot.slane %v1139_v31, 1 }
 0x46f   : > { %v1141_v33 = vadd.f32 %v1140_v32, %v1139_v31 }
 0x471   : > { %1811 = vrcp.f32 %v1141_v33 }
 0x477   : > { %v1812_v34 = vpop.eup %1811 }
 0x478   : > { %v1143_v35 = vmul.f32 %v1812_v34, %v1134_v26 }
 0x47a   : > { %v1144_v36 = vmul.f32 %v1143_v35, %v2561_v4 }
 0x47c   : > { %1145 = vst.msk [vmem:[%s731_s8] sm:$0xff] %vm765_vm0, %v1144_v36 }
 0x47d   : > { %2175 = shalt.err (!%p2172_p12)
}
 0x47e   : > { %1676 = dma.vmem_to_hbm [thread:$0]  (%p2413_p0), %s1213_s30, 128, %s1215_s29, %s1152_s1  }
 0x47f PF: > { %s2874_s12 = sld [smem:[#allocation33_spill]]  ;;  %p2876_p10 = scmp.ge.s32.totalorder %s2242_s27, 2 }
 0x481   : > { %p1710_p2 = pnand %p2876_p10, %p2423_p8 }
 0x483   : > { %p1711_p3 = pneg %p1710_p2 }
 0x485   : > { %s1277_s28 = sand.u32 1, %s2874_s12  }
 0x486   : > { %s1278_s23 = scalar_lea.sflag [#allocation4], %s1277_s28 }
 0x487   : > { %2213 = dma.done.wait (%p1711_p3), %s1278_s23, 128  }
 0x488   : > { %2215 = vsyncadd (%p1711_p3), %s1278_s23, 4294967168  ;;  %s2877_s5 = sadd.s32 4294967294, %s2242_s27  }
 0x489   : > { %s1287_s6 = sand.u32 1, %s2877_s5  }
 0x48a   : > { %s1288_s14 = scalar_lea.sflag [#allocation17], %s1287_s6 }
 0x48b   : > { %2217 = dma.done.wait (%p1711_p3), %s1288_s14, 256  }
 0x48c   : > { %2219 = vsyncadd (%p1711_p3), %s1288_s14, 4294967040  ;;  %s1308_s18 = scalar_lea.sflag [#allocation20], %s1287_s6 }
 0x48d   : > { %2221 = dma.done.wait (%p1711_p3), %s1308_s18, 512  }
 0x48e   : > { %2223 = vsyncadd (%p1711_p3), %s1308_s18, 4294966784  ;;  %s1328_s2 = scalar_lea.sflag [#allocation23], %s1277_s28 }
 0x48f   : > { %2225 = dma.done.wait (%p1711_p3), %s1328_s2, 256  }
 0x490   : > { %2227 = vsyncadd (%p1711_p3), %s1328_s2, 4294967040  ;;  %s2878_s27 = sld [smem:[#allocation35_spill]]  ;;  %s2881_s24 = smov %s2234_s25 }
 0x491   : > { %s2879_s1 = sld [smem:[#allocation34_spill]] }
 0x492   : > { %s2880_s26 = sld [smem:[#allocation36_spill]] }
 0x496   : > { %p46_p0 = scmp.ge.s32.totalorder %s2878_s27, 4  }
 0x497   : > { %s2882_s25 = smov %s2879_s1 }
 0x498   :  { %48 = sbr.rel (!%p46_p0) target bundleno = 33 (0x21), region = 239 }
 0x49d   :  { %1334 = vsyncpa [#allocation3], 1 }
 0x49e   :  { %1336 = vsyncpa [#allocation3 + $0x1], 1 }
 0x49f   :  { %1337 = vsyncpa [#allocation8], 1 }
 0x4a0   :  { %1339 = vsyncpa [#allocation8 + $0x1], 1 }
 0x4a1   :  { %1340 = vsyncpa [#allocation11], 1 }
 0x4a2   :  { %1341 = vsyncpa [#allocation14], 1 }
 0x4a3   :  { %1342 = vsyncpa [#allocation4], 1 }
 0x4a4   :  { %1344 = vsyncpa [#allocation4 + $0x1], 1 }
 0x4a5   :  { %1345 = vsyncpa [#allocation17], 1 }
 0x4a6   :  { %1347 = vsyncpa [#allocation17 + $0x1], 1 }
 0x4a7   :  { %1348 = vsyncpa [#allocation20], 1 }
 0x4a8   :  { %1350 = vsyncpa [#allocation20 + $0x1], 1 }
 0x4a9   :  { %1351 = vsyncpa [#allocation23], 1 }
 0x4aa   :  { %1353 = vsyncpa [#allocation23 + $0x1], 1 }
 0x4ab   :  { %1354 = vsyncpa [#allocation5], 1 }
 0x4ac   :  { %1356 = vsyncpa [#allocation5 + $0x1], 1 }

</bundles_post_ra>
